<compile_context>
chip_gen: v7x
topology: tpu7x:2x2x1
jax: 0.10.0
libtpu: 0.0.40
codegen_flags: <defaults>
</compile_context>

<pallas_src>
import functools

import jax
import jax.numpy as jnp
from jax.experimental import pallas as pl
from jax.experimental.pallas import tpu as pltpu


# --------------------------- VMEM sizing (per-gen) ---------------------------

def _vmem_sizes():
    """Generation-aware VMEM sizing (v5e/v6e: 128 MiB, v7x: 64 MiB per core)."""
    cap = 64 * 1024 * 1024                           # conservative default (v7x)
    try:
        info = pltpu.get_tpu_info()
        cap = int(getattr(info, "vmem_capacity_bytes", cap)) or cap
    except Exception:
        pass
    budget = int(cap * 0.45)                         # tile-picking working-set budget
    limit = min(int(cap * 0.75), 112 * 1024 * 1024)  # scoped limit handed to Mosaic
    return budget, limit


_VMEM_BUDGET, _VMEM_LIMIT = _vmem_sizes()
_RESIDENT_W_BYTES = 4 * 1024 * 1024                  # keep 1x1 weights resident below this


# ------------------------------ Pallas kernels -------------------------------

def _mm_bn_kernel(x_ref, w_ref, s_ref, b_ref, o_ref, *, relu):
    """out = (x @ w) * scale + bias [+ relu]; bf16 MXU operands, f32 accumulate."""
    acc = jnp.dot(x_ref[...].astype(jnp.bfloat16), w_ref[...],
                  preferred_element_type=jnp.float32)
    out = acc * s_ref[...] + b_ref[...]
    if relu:
        out = jnp.maximum(out, 0.0)
    o_ref[...] = out.astype(o_ref.dtype)


def _mm_bn_res_kernel(x_ref, w_ref, s_ref, b_ref, r_ref, o_ref):
    """out = relu((x @ w) * scale + bias + residual); residual added in f32."""
    acc = jnp.dot(x_ref[...].astype(jnp.bfloat16), w_ref[...],
                  preferred_element_type=jnp.float32)
    out = acc * s_ref[...] + b_ref[...] + r_ref[...].astype(jnp.float32)
    o_ref[...] = jnp.maximum(out, 0.0).astype(o_ref.dtype)


def _mm_bn_proj_kernel(x_ref, w_ref, s_ref, b_ref,
                       xs_ref, ws_ref, ss_ref, bs_ref, o_ref):
    """out = relu((x @ w)*s + b + (xs @ ws)*ss + bs); both branches fused in-tile."""
    out = jnp.dot(x_ref[...].astype(jnp.bfloat16), w_ref[...],
                  preferred_element_type=jnp.float32)
    out = out * s_ref[...] + b_ref[...]
    sc = jnp.dot(xs_ref[...].astype(jnp.bfloat16), ws_ref[...],
                 preferred_element_type=jnp.float32)
    out = out + sc * ss_ref[...] + bs_ref[...]
    o_ref[...] = jnp.maximum(out, 0.0).astype(o_ref.dtype)


def _conv3x3_bn_relu_kernel(x_ref, w_ref, s_ref, b_ref, o_ref, *, groups, rt, wo, c):
    """Fused 3x3 conv (pad=1) + BN + ReLU for one row tile of one image.

    x_ref: (1, n_phase, PH, PW, C)  full phase-decomposed padded image (bf16,
                                    revisited across row tiles -> DMA'd once/img)
    w_ref: (9*C, Cout)              group-packed tap weights (bf16)
    s_ref/b_ref: (1, Cout)          folded-BN scale/bias (f32)
    o_ref: (1, rt*Wo, Cout)         flattened output row tile
    Taps sharing a stride-phase are concatenated along the contraction dim so
    each group is a single deep matmul; accumulation is f32 in-kernel.
    """
    row0 = pl.program_id(1) * rt
    cout = o_ref.shape[-1]
    acc = jnp.zeros((rt * wo, cout), jnp.float32)
    woff = 0
    for ph, taps in groups:
        parts = [x_ref[0, ph, pl.ds(row0 + ro, rt), pl.ds(co, wo), :]
                 for (ro, co) in taps]
        lhs = parts[0] if len(parts) == 1 else jnp.concatenate(parts, axis=-1)
        kdim = len(taps) * c
        acc = acc + jnp.dot(lhs.reshape(rt * wo, kdim),
                            w_ref[pl.ds(woff, kdim), :],
                            preferred_element_type=jnp.float32)
        woff += kdim
    out = jnp.maximum(acc * s_ref[...] + b_ref[...], 0.0)
    o_ref[...] = out.reshape(1, rt * wo, cout).astype(o_ref.dtype)


# ------------------------------ tile selection --------------------------------

def _pick_mm_tiles(m, n, k_stream_bytes, w_total_bytes, res_elt_bytes, out_elt_bytes):
    """VMEM-aware (tm, tn) for the 1x1-conv matmuls.

    Keeps the full weight(s) resident whenever they fit a small slice of the
    budget (avoids re-streaming the weight once per row tile); otherwise tiles
    N in lane-dense 512 chunks.
    """
    if w_total_bytes <= _RESIDENT_W_BYTES or n <= 512 or n % 512 != 0:
        tn = n
    else:
        tn = 512
    w_tile_bytes = w_total_bytes * tn // n
    fixed = w_tile_bytes + 4 * 4 * tn                      # weights + f32 scale/bias rows
    # double-buffered activation / residual / output streams + f32 epilogue temps
    per_row = 2 * (k_stream_bytes + (res_elt_bytes + out_elt_bytes) * tn) + 4 * tn
    tm = 8
    cand = 16
    while cand <= 4096 and fixed + cand * per_row <= _VMEM_BUDGET:
        tm = cand
        cand *= 2
    # keep >=2 grid steps when possible (megacore sharding + DMA/compute overlap)
    while tm > 8 and pl.cdiv(m, tm) < 2:
        tm //= 2
    return tm, tn


def _pick_row_tile(n_img, ho, wo, cout):
    """Largest divisor of Ho keeping the f32 accumulator small and blocks aligned."""
    divisors = [d for d in range(1, ho + 1) if ho % d == 0]
    aligned = [d for d in divisors if d == ho or (d * wo) % 8 == 0]   # (8,128) rule
    fits = [d for d in aligned if d * wo * cout * 4 <= 128 * 1024]
    rt = fits[-1] if fits else aligned[0]
    # keep >=2 total grid steps when possible (pipelining / megacore)
    while rt > aligned[0] and n_img * (ho // rt) < 2:
        rt = max(d for d in aligned if d < rt)
    return rt


# ------------------------------ pallas wrappers --------------------------------

def matmul_bn(x, w, scale, bias, *, relu, residual=None, proj=None,
              out_dtype=jnp.bfloat16):
    """Fused 1x1-conv-as-matmul + folded BN (+ f32 residual | + projection shortcut)
    (+ ReLU).

    x: (M, K); w: (K, N); residual: (M, N) added in f32;
    proj = (xs, ws, ss, bs): second matmul branch fused in-tile (projection shortcut).
    MXU operands are bf16 (cast in-kernel); accumulation and BN affines are f32.
    """
    M, K = x.shape
    N = w.shape[1]

    k_stream = x.dtype.itemsize * K
    w_total = 2 * K * N
    res_elt = residual.dtype.itemsize if residual is not None else 0
    if proj is not None:
        xs, ws, ss, bs = proj
        K2 = xs.shape[1]
        k_stream += xs.dtype.itemsize * K2
        w_total += 2 * K2 * N

    out_elt = jnp.dtype(out_dtype).itemsize
    tm, tn = _pick_mm_tiles(M, N, k_stream, w_total, res_elt, out_elt)
    grid = (pl.cdiv(M, tm), pl.cdiv(N, tn))

    in_specs = [
        pl.BlockSpec((tm, K), lambda i, j: (i, 0)),
        pl.BlockSpec((K, tn), lambda i, j: (0, j)),
        pl.BlockSpec((1, tn), lambda i, j: (0, j)),
        pl.BlockSpec((1, tn), lambda i, j: (0, j)),
    ]
    args = [x, w.astype(jnp.bfloat16),
            scale.reshape(1, N).astype(jnp.float32),
            bias.reshape(1, N).astype(jnp.float32)]

    flops = 2 * M * K * N
    bytes_acc = x.dtype.itemsize * M * K + 2 * K * N + out_elt * M * N + 8 * N

    if proj is not None:
        kern = _mm_bn_proj_kernel
        xs, ws, ss, bs = proj
        K2 = xs.shape[1]
        in_specs += [
            pl.BlockSpec((tm, K2), lambda i, j: (i, 0)),
            pl.BlockSpec((K2, tn), lambda i, j: (0, j)),
            pl.BlockSpec((1, tn), lambda i, j: (0, j)),
            pl.BlockSpec((1, tn), lambda i, j: (0, j)),
        ]
        args += [xs, ws.astype(jnp.bfloat16),
                 ss.reshape(1, N).astype(jnp.float32),
                 bs.reshape(1, N).astype(jnp.float32)]
        flops += 2 * M * K2 * N
        bytes_acc += xs.dtype.itemsize * M * K2 + 2 * K2 * N + 8 * N
    elif residual is not None:
        kern = _mm_bn_res_kernel
        in_specs.append(pl.BlockSpec((tm, tn), lambda i, j: (i, j)))
        args.append(residual)
        bytes_acc += res_elt * M * N
    else:
        kern = functools.partial(_mm_bn_kernel, relu=relu)

    cost = pl.CostEstimate(flops=flops, transcendentals=0, bytes_accessed=bytes_acc)

    return pl.pallas_call(
        kern,
        out_shape=jax.ShapeDtypeStruct((M, N), out_dtype),
        grid_spec=pltpu.PrefetchScalarGridSpec(
            num_scalar_prefetch=0,
            grid=grid,
            in_specs=in_specs,
            out_specs=pl.BlockSpec((tm, tn), lambda i, j: (i, j)),
        ),
        compiler_params=pltpu.CompilerParams(
            dimension_semantics=("parallel", "parallel"),
            vmem_limit_bytes=_VMEM_LIMIT),
        cost_estimate=cost,
    )(*args)


def conv3x3_bn_relu(x_nhwc, w_oihw, scale, bias, stride, out_dtype=jnp.bfloat16):
    """Fused 3x3 conv (padding=1, given stride) + BN + ReLU, no im2col.

    Stride > 1 inputs are phase-decomposed in the wrapper so every tap is a
    unit-stride shift inside the kernel (stride 1 skips the decomposition).
    The grid is (image, output-row tile); taps sharing a phase are merged into
    one deep matmul per group.
    """
    N, H, W, C = x_nhwc.shape
    Cout = w_oihw.shape[0]
    s = stride
    Ho = (H + 2 - 3) // s + 1
    Wo = (W + 2 - 3) // s + 1
    off = 2 // s                       # largest intra-phase tap offset
    PH, PW = Ho + off, Wo + off

    need_h = (s - 1) + (PH - 1) * s + 1
    need_w = (s - 1) + (PW - 1) * s + 1
    xp = jnp.pad(x_nhwc, ((0, 0), (1, need_h - H - 1), (1, need_w - W - 1), (0, 0)))

    if s == 1:
        phases = xp[:, None]           # (N, 1, PH, PW, C), free reshape (no stack pass)
    else:
        phases = jnp.stack(
            [xp[:, a:a + (PH - 1) * s + 1:s, b:b + (PW - 1) * s + 1:s, :]
             for a in range(s) for b in range(s)], axis=1)   # (N, s*s, PH, PW, C)

    # group taps by stride-phase; taps within a group get merged along K
    groups = []
    for ph in range(s * s):
        taps = tuple((kh // s, kw // s) for kh in range(3) for kw in range(3)
                     if (kh % s) * s + (kw % s) == ph)
        if taps:
            groups.append((ph, taps))
    groups = tuple(groups)

    # pack weights group-major: (9*C, Cout)
    w_khwc = jnp.transpose(w_oihw, (2, 3, 1, 0))             # (3, 3, Cin, Cout)
    w_parts = []
    for ph, taps in groups:
        a, b = ph // s, ph % s
        for ro, co in taps:
            w_parts.append(w_khwc[ro * s + a, co * s + b])    # (Cin, Cout)
    w_packed = jnp.concatenate(w_parts, axis=0).astype(jnp.bfloat16)

    rt = _pick_row_tile(N, Ho, Wo, Cout)
    n_rt = Ho // rt
    n_phase = phases.shape[1]

    kern = functools.partial(_conv3x3_bn_relu_kernel,
                             groups=groups, rt=rt, wo=Wo, c=C)
    cost = pl.CostEstimate(
        flops=2 * N * Ho * Wo * 9 * C * Cout, transcendentals=0,
        bytes_accessed=(2 * N * n_phase * PH * PW * C + 2 * 9 * C * Cout
                        + jnp.dtype(out_dtype).itemsize * N * Ho * Wo * Cout
                        + 8 * Cout))

    out = pl.pallas_call(
        kern,
        out_shape=jax.ShapeDtypeStruct((N, Ho * Wo, Cout), out_dtype),
        grid_spec=pltpu.PrefetchScalarGridSpec(
            num_scalar_prefetch=0,
            grid=(N, n_rt),
            in_specs=[
                # same block index across row tiles -> image DMA'd once, revisited
                pl.BlockSpec((1, n_phase, PH, PW, C), lambda n, r: (n, 0, 0, 0, 0)),
                pl.BlockSpec((9 * C, Cout), lambda n, r: (0, 0)),
                pl.BlockSpec((1, Cout), lambda n, r: (0, 0)),
                pl.BlockSpec((1, Cout), lambda n, r: (0, 0)),
            ],
            out_specs=pl.BlockSpec((1, rt * Wo, Cout), lambda n, r: (n, r, 0)),
        ),
        compiler_params=pltpu.CompilerParams(
            dimension_semantics=("parallel", "parallel"),
            vmem_limit_bytes=_VMEM_LIMIT),
        cost_estimate=cost,
    )(phases.astype(jnp.bfloat16), w_packed,
      scale.reshape(1, Cout).astype(jnp.float32),
      bias.reshape(1, Cout).astype(jnp.float32))
    return out.reshape(N, Ho, Wo, Cout), Ho, Wo


# -------------------------------- glue (JAX) ----------------------------------

def fold_bn(gamma, beta, mean, var, eps=1e-5):
    scale = gamma / jnp.sqrt(var + eps)
    bias = beta - mean * scale
    return scale, bias


def bottleneck_forward(x_nchw, params, stride):
    """Pallas-backed Bottleneck forward. Input/output NCHW f32 like PyTorch."""
    eps = 1e-5
    x = jnp.transpose(x_nchw, (0, 2, 3, 1))                  # NHWC, f32
    N, H, W, Cin = x.shape
    planes = params["w1"].shape[0]
    out_c = params["w3"].shape[0]

    # conv1 (1x1) + bn1 + relu  (x stays f32 in HBM; cast to bf16 in-kernel)
    w1 = params["w1"][:, :, 0, 0].T                          # (Cin, planes)
    s1, b1 = fold_bn(*params["bn1"], eps)
    o1 = matmul_bn(x.reshape(N * H * W, Cin), w1, s1, b1, relu=True,
                   out_dtype=jnp.bfloat16)
    o1 = o1.reshape(N, H, W, planes)

    # conv2 (3x3, stride, pad=1) + bn2 + relu — fused tap-group accumulation
    s2, b2 = fold_bn(*params["bn2"], eps)
    o2, Ho, Wo = conv3x3_bn_relu(o1, params["w2"], s2, b2, stride,
                                 out_dtype=jnp.bfloat16)
    o2 = o2.reshape(N * Ho * Wo, planes)

    w3 = params["w3"][:, :, 0, 0].T
    s3, b3 = fold_bn(*params["bn3"], eps)

    if params.get("ws") is not None:
        # projection shortcut fused into the conv3 kernel (no HBM round trip).
        # TODO(synk): the stride-2 pixel selection is still an XLA strided slice.
        xs = x[:, ::stride, ::stride, :].reshape(N * Ho * Wo, Cin)
        ws = params["ws"][:, :, 0, 0].T
        ss, bs = fold_bn(*params["bns"], eps)
        o3 = matmul_bn(o2, w3, s3, b3, relu=True,
                       proj=(xs, ws, ss, bs), out_dtype=jnp.bfloat16)
    else:
        # identity shortcut (stride == 1 by construction), kept in f32
        res = x.reshape(N * H * W, Cin)
        o3 = matmul_bn(o2, w3, s3, b3, relu=True, residual=res,
                       out_dtype=jnp.bfloat16)

    o3 = o3.reshape(N, Ho, Wo, out_c)
    # NHWC -> NCHW in bf16; restore f32 at the block boundary (fused by XLA)
    return jnp.transpose(o3, (0, 3, 1, 2)).astype(jnp.float32)


# ----------------------------- pure-JAX reference ------------------------------

def bottleneck_ref(x, params, stride):
    eps = 1e-5

    def conv(x, w, s=1, p=0):
        return jax.lax.conv_general_dilated(
            x, w, (s, s), [(p, p), (p, p)],
            dimension_numbers=("NCHW", "OIHW", "NCHW"))

    def bn(x, prm):
        g, b, m, v = prm
        sc = g / jnp.sqrt(v + eps)
        return x * sc[None, :, None, None] + (b - m * sc)[None, :, None, None]

    out = jax.nn.relu(bn(conv(x, params["w1"]), params["bn1"]))
    out = jax.nn.relu(bn(conv(out, params["w2"], s=stride, p=1), params["bn2"]))
    out = bn(conv(out, params["w3"]), params["bn3"])
    if params.get("ws") is not None:
        sc = bn(conv(x, params["ws"], s=stride), params["bns"])
    else:
        sc = x
    return jax.nn.relu(out + sc)


# -------------------------------- param init -----------------------------------

def init_params(key, in_planes, planes, stride):
    exp = 4
    ks = jax.random.split(key, 8)

    def bn_params(k, c):
        k1, k2, k3, k4 = jax.random.split(k, 4)
        gamma = 1.0 + 0.1 * jax.random.normal(k1, (c,), jnp.float32)
        beta = 0.1 * jax.random.normal(k2, (c,), jnp.float32)
        mean = 0.1 * jax.random.normal(k3, (c,), jnp.float32)
        var = jax.random.uniform(k4, (c,), jnp.float32, 0.5, 1.5)
        return (gamma, beta, mean, var)

    p = {
        "w1": 0.2 * jax.random.normal(ks[0], (planes, in_planes, 1, 1), jnp.float32),
        "bn1": bn_params(ks[1], planes),
        "w2": 0.2 * jax.random.normal(ks[2], (planes, planes, 3, 3), jnp.float32),
        "bn2": bn_params(ks[3], planes),
        "w3": 0.2 * jax.random.normal(ks[4], (exp * planes, planes, 1, 1), jnp.float32),
        "bn3": bn_params(ks[5], exp * planes),
        "ws": None,
        "bns": None,
    }
    if stride != 1 or in_planes != exp * planes:
        p["ws"] = 0.2 * jax.random.normal(
            ks[6], (exp * planes, in_planes, 1, 1), jnp.float32)
        p["bns"] = bn_params(ks[7], exp * planes)
    return p


# ----------------------------------- main ---------------------------------------

if __name__ == "__main__":
    key = jax.random.PRNGKey(0)
    N, H, W = 2, 16, 16

    # (in_planes, planes, stride): projection+stride, projection, and identity
    configs = [(4, 4, 2), (4, 4, 1), (16, 4, 1)]

    fwd = jax.jit(bottleneck_forward, static_argnums=2)

    for in_planes, planes, stride in configs:
        kp, kx, key = jax.random.split(key, 3)
        params = init_params(kp, in_planes, planes, stride)
        x = jax.random.normal(kx, (N, in_planes, H, W), jnp.float32)

        out = jax.block_until_ready(fwd(x, params, stride))
        ref = bottleneck_ref(x, params, stride)

        assert out.shape == ref.shape, (out.shape, ref.shape)
        err = float(jnp.max(jnp.abs(out - ref)))
        tol = 1e-2 + 2e-2 * float(jnp.max(jnp.abs(ref)))   # bf16 matmul operands
        if not (err <= tol):
            raise AssertionError(
                f"mismatch for config {(in_planes, planes, stride)}: "
                f"max|err|={err} tol={tol}")

    print("KERNEL_OK")
</pallas_src>

<mosaic_0001>
module attributes {stable_mosaic.version = 11 : i64} {
  func.func @_mm_bn_kernel(%arg0: i32, %arg1: i32, %arg2: memref<256x4xf32, #tpu.memory_space<vmem>>, %arg3: memref<4x4xbf16, #tpu.memory_space<vmem>>, %arg4: memref<1x4xf32, #tpu.memory_space<vmem>>, %arg5: memref<1x4xf32, #tpu.memory_space<vmem>>, %arg6: memref<256x4xbf16, #tpu.memory_space<vmem>>) attributes {dimension_semantics = [#tpu.dimension_semantics<parallel>, #tpu.dimension_semantics<parallel>], iteration_bounds = array<i64: 2, 1>, scalar_prefetch = 0 : i64, scratch_operands = 0 : i64, tpu.core_type = #tpu.core_type<tc>, window_params = [{transform_indices = @transform_0, window_bounds = array<i64: 256, 4>}, {transform_indices = @transform_1, window_bounds = array<i64: 4, 4>}, {transform_indices = @transform_2, window_bounds = array<i64: 1, 4>}, {transform_indices = @transform_3, window_bounds = array<i64: 1, 4>}, {transform_indices = @transform_4, window_bounds = array<i64: 256, 4>}]} {
    %c0 = arith.constant 0 : index
    %c0_0 = arith.constant 0 : index
    %0 = vector.load %arg2[%c0, %c0_0] : memref<256x4xf32, #tpu.memory_space<vmem>>, vector<256x4xf32>
    %1 = arith.truncf %0 : vector<256x4xf32> to vector<256x4xbf16>
    %c0_1 = arith.constant 0 : index
    %c0_2 = arith.constant 0 : index
    %2 = vector.load %arg3[%c0_1, %c0_2] : memref<4x4xbf16, #tpu.memory_space<vmem>>, vector<4x4xbf16>
    %cst = arith.constant dense<0.000000e+00> : vector<256x4xf32>
    %3 = tpu.matmul %1, %2, %cst {dimension_numbers = #tpu.dot_dimension_numbers<[1], [0], [0], [1], [0, 0, 1, 1], [], []>} : vector<256x4xbf16>, vector<4x4xbf16>, vector<256x4xf32> -> vector<256x4xf32>
    %c0_3 = arith.constant 0 : index
    %c0_4 = arith.constant 0 : index
    %4 = vector.load %arg4[%c0_3, %c0_4] : memref<1x4xf32, #tpu.memory_space<vmem>>, vector<1x4xf32>
    %5 = vector.broadcast %4 : vector<1x4xf32> to vector<256x4xf32>
    %6 = arith.mulf %3, %5 : vector<256x4xf32>
    %c0_5 = arith.constant 0 : index
    %c0_6 = arith.constant 0 : index
    %7 = vector.load %arg5[%c0_5, %c0_6] : memref<1x4xf32, #tpu.memory_space<vmem>>, vector<1x4xf32>
    %8 = vector.broadcast %7 : vector<1x4xf32> to vector<256x4xf32>
    %9 = arith.addf %6, %8 : vector<256x4xf32>
    %cst_7 = arith.constant 0.000000e+00 : f32
    %10 = vector.broadcast %cst_7 : f32 to vector<256x4xf32>
    %11 = arith.maximumf %9, %10 : vector<256x4xf32>
    %12 = arith.truncf %11 : vector<256x4xf32> to vector<256x4xbf16>
    %c0_8 = arith.constant 0 : index
    %c0_9 = arith.constant 0 : index
    %13 = vector.load %arg6[%c0_8, %c0_9] : memref<256x4xbf16, #tpu.memory_space<vmem>>, vector<256x4xbf16>
    tpu.vector_store %arg6[%c0_8, %c0_9], %12 {strides = array<i32>} : memref<256x4xbf16, #tpu.memory_space<vmem>>, vector<256x4xbf16>,
    return
  }
  func.func @transform_0(%arg0: i32, %arg1: i32) -> (i32, i32) {
    %c0_i32 = arith.constant 0 : i32
    %c0_i32_0 = arith.constant 0 : i32
    return %arg0, %c0_i32 : i32, i32
  }
  func.func @transform_1(%arg0: i32, %arg1: i32) -> (i32, i32) {
    %c0_i32 = arith.constant 0 : i32
    %c0_i32_0 = arith.constant 0 : i32
    return %c0_i32, %arg1 : i32, i32
  }
  func.func @transform_2(%arg0: i32, %arg1: i32) -> (i32, i32) {
    %c0_i32 = arith.constant 0 : i32
    %c0_i32_0 = arith.constant 0 : i32
    return %c0_i32, %arg1 : i32, i32
  }
  func.func @transform_3(%arg0: i32, %arg1: i32) -> (i32, i32) {
    %c0_i32 = arith.constant 0 : i32
    %c0_i32_0 = arith.constant 0 : i32
    return %c0_i32, %arg1 : i32, i32
  }
  func.func @transform_4(%arg0: i32, %arg1: i32) -> (i32, i32) {
    %c0_i32 = arith.constant 0 : i32
    return %arg0, %arg1 : i32, i32
  }
}

module attributes {stable_mosaic.version = 11 : i64} {
  func.func @_conv3x3_bn_relu_kernel(%arg0: i32, %arg1: i32, %arg2: memref<1x4x9x9x4xbf16, #tpu.memory_space<vmem>>, %arg3: memref<36x4xbf16, #tpu.memory_space<vmem>>, %arg4: memref<1x4xf32, #tpu.memory_space<vmem>>, %arg5: memref<1x4xf32, #tpu.memory_space<vmem>>, %arg6: memref<1x64x4xbf16, #tpu.memory_space<vmem>>) attributes {dimension_semantics = [#tpu.dimension_semantics<parallel>, #tpu.dimension_semantics<parallel>], iteration_bounds = array<i64: 2, 1>, scalar_prefetch = 0 : i64, scratch_operands = 0 : i64, tpu.core_type = #tpu.core_type<tc>, window_params = [{transform_indices = @transform_0, window_bounds = array<i64: 1, 4, 9, 9, 4>}, {pipeline_mode = #tpu.pipeline_mode<synchronous>, transform_indices = @transform_1, window_bounds = array<i64: 36, 4>}, {pipeline_mode = #tpu.pipeline_mode<synchronous>, transform_indices = @transform_2, window_bounds = array<i64: 1, 4>}, {pipeline_mode = #tpu.pipeline_mode<synchronous>, transform_indices = @transform_3, window_bounds = array<i64: 1, 4>}, {transform_indices = @transform_4, window_bounds = array<i64: 1, 64, 4>}]} {
    %c8_i32 = arith.constant 8 : i32
    %0 = arith.muli %arg1, %c8_i32 : i32
    %cst = arith.constant 0.000000e+00 : f32
    %1 = vector.broadcast %cst : f32 to vector<64x4xf32>
    %c0_i32 = arith.constant 0 : i32
    %2 = arith.addi %0, %c0_i32 : i32
    %c0 = arith.constant 0 : index
    %c0_0 = arith.constant 0 : index
    %3 = arith.index_cast %2 : i32 to index
    %c0_1 = arith.constant 0 : index
    %c0_2 = arith.constant 0 : index
    %4 = vector.load %arg2[%c0, %c0_0, %3, %c0_1, %c0_2] : memref<1x4x9x9x4xbf16, #tpu.memory_space<vmem>>, vector<1x1x8x8x4xbf16>
    %5 = vector.shape_cast %4 : vector<1x1x8x8x4xbf16> to vector<8x8x4xbf16>
    %c0_i32_3 = arith.constant 0 : i32
    %6 = arith.addi %0, %c0_i32_3 : i32
    %c0_4 = arith.constant 0 : index
    %c0_5 = arith.constant 0 : index
    %7 = arith.index_cast %6 : i32 to index
    %c1 = arith.constant 1 : index
    %c0_6 = arith.constant 0 : index
    %8 = vector.load %arg2[%c0_4, %c0_5, %7, %c1, %c0_6] : memref<1x4x9x9x4xbf16, #tpu.memory_space<vmem>>, vector<1x1x8x8x4xbf16>
    %9 = vector.shape_cast %8 : vector<1x1x8x8x4xbf16> to vector<8x8x4xbf16>
    %c1_i32 = arith.constant 1 : i32
    %10 = arith.addi %0, %c1_i32 : i32
    %c0_7 = arith.constant 0 : index
    %c0_8 = arith.constant 0 : index
    %11 = arith.index_cast %10 : i32 to index
    %c0_9 = arith.constant 0 : index
    %c0_10 = arith.constant 0 : index
    %12 = vector.load %arg2[%c0_7, %c0_8, %11, %c0_9, %c0_10] : memref<1x4x9x9x4xbf16, #tpu.memory_space<vmem>>, vector<1x1x8x8x4xbf16>
    %13 = vector.shape_cast %12 : vector<1x1x8x8x4xbf16> to vector<8x8x4xbf16>
    %c1_i32_11 = arith.constant 1 : i32
    %14 = arith.addi %0, %c1_i32_11 : i32
    %c0_12 = arith.constant 0 : index
    %c0_13 = arith.constant 0 : index
    %15 = arith.index_cast %14 : i32 to index
    %c1_14 = arith.constant 1 : index
    %c0_15 = arith.constant 0 : index
    %16 = vector.load %arg2[%c0_12, %c0_13, %15, %c1_14, %c0_15] : memref<1x4x9x9x4xbf16, #tpu.memory_space<vmem>>, vector<1x1x8x8x4xbf16>
    %17 = vector.shape_cast %16 : vector<1x1x8x8x4xbf16> to vector<8x8x4xbf16>
    %18 = tpu.concatenate %5, %9, %13, %17 in 2 : vector<8x8x4xbf16>, vector<8x8x4xbf16>, vector<8x8x4xbf16>, vector<8x8x4xbf16> -> vector<8x8x16xbf16>
    %19 = vector.shape_cast %18 : vector<8x8x16xbf16> to vector<64x16xbf16>
    %c0_16 = arith.constant 0 : index
    %c0_17 = arith.constant 0 : index
    %20 = vector.load %arg3[%c0_16, %c0_17] : memref<36x4xbf16, #tpu.memory_space<vmem>>, vector<16x4xbf16>
    %cst_18 = arith.constant dense<0.000000e+00> : vector<64x4xf32>
    %21 = tpu.matmul %19, %20, %cst_18 {dimension_numbers = #tpu.dot_dimension_numbers<[1], [0], [0], [1], [0, 0, 1, 1], [], []>} : vector<64x16xbf16>, vector<16x4xbf16>, vector<64x4xf32> -> vector<64x4xf32>
    %22 = arith.addf %1, %21 : vector<64x4xf32>
    %c0_i32_19 = arith.constant 0 : i32
    %23 = arith.addi %0, %c0_i32_19 : i32
    %c0_20 = arith.constant 0 : index
    %c1_21 = arith.constant 1 : index
    %24 = arith.index_cast %23 : i32 to index
    %c0_22 = arith.constant 0 : index
    %c0_23 = arith.constant 0 : index
    %25 = vector.load %arg2[%c0_20, %c1_21, %24, %c0_22, %c0_23] : memref<1x4x9x9x4xbf16, #tpu.memory_space<vmem>>, vector<1x1x8x8x4xbf16>
    %26 = vector.shape_cast %25 : vector<1x1x8x8x4xbf16> to vector<8x8x4xbf16>
    %c1_i32_24 = arith.constant 1 : i32
    %27 = arith.addi %0, %c1_i32_24 : i32
    %c0_25 = arith.constant 0 : index
    %c1_26 = arith.constant 1 : index
    %28 = arith.index_cast %27 : i32 to index
    %c0_27 = arith.constant 0 : index
    %c0_28 = arith.constant 0 : index
    %29 = vector.load %arg2[%c0_25, %c1_26, %28, %c0_27, %c0_28] : memref<1x4x9x9x4xbf16, #tpu.memory_space<vmem>>, vector<1x1x8x8x4xbf16>
    %30 = vector.shape_cast %29 : vector<1x1x8x8x4xbf16> to vector<8x8x4xbf16>
    %31 = tpu.concatenate %26, %30 in 2 : vector<8x8x4xbf16>, vector<8x8x4xbf16> -> vector<8x8x8xbf16>
    %32 = vector.shape_cast %31 : vector<8x8x8xbf16> to vector<64x8xbf16>
    %c16 = arith.constant 16 : index
    %c0_29 = arith.constant 0 : index
    %33 = vector.load %arg3[%c16, %c0_29] : memref<36x4xbf16, #tpu.memory_space<vmem>>, vector<8x4xbf16>
    %cst_30 = arith.constant dense<0.000000e+00> : vector<64x4xf32>
    %34 = tpu.matmul %32, %33, %cst_30 {dimension_numbers = #tpu.dot_dimension_numbers<[1], [0], [0], [1], [0, 0, 1, 1], [], []>} : vector<64x8xbf16>, vector<8x4xbf16>, vector<64x4xf32> -> vector<64x4xf32>
    %35 = arith.addf %22, %34 : vector<64x4xf32>
    %c0_i32_31 = arith.constant 0 : i32
    %36 = arith.addi %0, %c0_i32_31 : i32
    %c0_32 = arith.constant 0 : index
    %c2 = arith.constant 2 : index
    %37 = arith.index_cast %36 : i32 to index
    %c0_33 = arith.constant 0 : index
    %c0_34 = arith.constant 0 : index
    %38 = vector.load %arg2[%c0_32, %c2, %37, %c0_33, %c0_34] : memref<1x4x9x9x4xbf16, #tpu.memory_space<vmem>>, vector<1x1x8x8x4xbf16>
    %39 = vector.shape_cast %38 : vector<1x1x8x8x4xbf16> to vector<8x8x4xbf16>
    %c0_i32_35 = arith.constant 0 : i32
    %40 = arith.addi %0, %c0_i32_35 : i32
    %c0_36 = arith.constant 0 : index
    %c2_37 = arith.constant 2 : index
    %41 = arith.index_cast %40 : i32 to index
    %c1_38 = arith.constant 1 : index
    %c0_39 = arith.constant 0 : index
    %42 = vector.load %arg2[%c0_36, %c2_37, %41, %c1_38, %c0_39] : memref<1x4x9x9x4xbf16, #tpu.memory_space<vmem>>, vector<1x1x8x8x4xbf16>
    %43 = vector.shape_cast %42 : vector<1x1x8x8x4xbf16> to vector<8x8x4xbf16>
    %44 = tpu.concatenate %39, %43 in 2 : vector<8x8x4xbf16>, vector<8x8x4xbf16> -> vector<8x8x8xbf16>
    %45 = vector.shape_cast %44 : vector<8x8x8xbf16> to vector<64x8xbf16>
    %c24 = arith.constant 24 : index
    %c0_40 = arith.constant 0 : index
    %46 = vector.load %arg3[%c24, %c0_40] : memref<36x4xbf16, #tpu.memory_space<vmem>>, vector<8x4xbf16>
    %cst_41 = arith.constant dense<0.000000e+00> : vector<64x4xf32>
    %47 = tpu.matmul %45, %46, %cst_41 {dimension_numbers = #tpu.dot_dimension_numbers<[1], [0], [0], [1], [0, 0, 1, 1], [], []>} : vector<64x8xbf16>, vector<8x4xbf16>, vector<64x4xf32> -> vector<64x4xf32>
    %48 = arith.addf %35, %47 : vector<64x4xf32>
    %c0_i32_42 = arith.constant 0 : i32
    %49 = arith.addi %0, %c0_i32_42 : i32
    %c0_43 = arith.constant 0 : index
    %c3 = arith.constant 3 : index
    %50 = arith.index_cast %49 : i32 to index
    %c0_44 = arith.constant 0 : index
    %c0_45 = arith.constant 0 : index
    %51 = vector.load %arg2[%c0_43, %c3, %50, %c0_44, %c0_45] : memref<1x4x9x9x4xbf16, #tpu.memory_space<vmem>>, vector<1x1x8x8x4xbf16>
    %52 = vector.shape_cast %51 : vector<1x1x8x8x4xbf16> to vector<8x8x4xbf16>
    %53 = vector.shape_cast %52 : vector<8x8x4xbf16> to vector<64x4xbf16>
    %c32 = arith.constant 32 : index
    %c0_46 = arith.constant 0 : index
    %54 = vector.load %arg3[%c32, %c0_46] : memref<36x4xbf16, #tpu.memory_space<vmem>>, vector<4x4xbf16>
    %cst_47 = arith.constant dense<0.000000e+00> : vector<64x4xf32>
    %55 = tpu.matmul %53, %54, %cst_47 {dimension_numbers = #tpu.dot_dimension_numbers<[1], [0], [0], [1], [0, 0, 1, 1], [], []>} : vector<64x4xbf16>, vector<4x4xbf16>, vector<64x4xf32> -> vector<64x4xf32>
    %56 = arith.addf %48, %55 : vector<64x4xf32>
    %c0_48 = arith.constant 0 : index
    %c0_49 = arith.constant 0 : index
    %57 = vector.load %arg4[%c0_48, %c0_49] : memref<1x4xf32, #tpu.memory_space<vmem>>, vector<1x4xf32>
    %58 = vector.broadcast %57 : vector<1x4xf32> to vector<64x4xf32>
    %59 = arith.mulf %56, %58 : vector<64x4xf32>
    %c0_50 = arith.constant 0 : index
    %c0_51 = arith.constant 0 : index
    %60 = vector.load %arg5[%c0_50, %c0_51] : memref<1x4xf32, #tpu.memory_space<vmem>>, vector<1x4xf32>
    %61 = vector.broadcast %60 : vector<1x4xf32> to vector<64x4xf32>
    %62 = arith.addf %59, %61 : vector<64x4xf32>
    %cst_52 = arith.constant 0.000000e+00 : f32
    %63 = vector.broadcast %cst_52 : f32 to vector<64x4xf32>
    %64 = arith.maximumf %62, %63 : vector<64x4xf32>
    %65 = vector.shape_cast %64 : vector<64x4xf32> to vector<1x64x4xf32>
    %66 = arith.truncf %65 : vector<1x64x4xf32> to vector<1x64x4xbf16>
    %c0_53 = arith.constant 0 : index
    %c0_54 = arith.constant 0 : index
    %c0_55 = arith.constant 0 : index
    %67 = vector.load %arg6[%c0_53, %c0_54, %c0_55] : memref<1x64x4xbf16, #tpu.memory_space<vmem>>, vector<1x64x4xbf16>
    tpu.vector_store %arg6[%c0_53, %c0_54, %c0_55], %66 {strides = array<i32>} : memref<1x64x4xbf16, #tpu.memory_space<vmem>>, vector<1x64x4xbf16>,
    return
  }
  func.func @transform_0(%arg0: i32, %arg1: i32) -> (i32, i32, i32, i32, i32) {
    %c0_i32 = arith.constant 0 : i32
    %c0_i32_0 = arith.constant 0 : i32
    %c0_i32_1 = arith.constant 0 : i32
    %c0_i32_2 = arith.constant 0 : i32
    %c0_i32_3 = arith.constant 0 : i32
    return %arg0, %c0_i32, %c0_i32_0, %c0_i32_1, %c0_i32_2 : i32, i32, i32, i32, i32
  }
  func.func @transform_1(%arg0: i32, %arg1: i32) -> (i32, i32) {
    %c0_i32 = arith.constant 0 : i32
    %c0_i32_0 = arith.constant 0 : i32
    %c0_i32_1 = arith.constant 0 : i32
    return %c0_i32, %c0_i32_0 : i32, i32
  }
  func.func @transform_2(%arg0: i32, %arg1: i32) -> (i32, i32) {
    %c0_i32 = arith.constant 0 : i32
    %c0_i32_0 = arith.constant 0 : i32
    %c0_i32_1 = arith.constant 0 : i32
    return %c0_i32, %c0_i32_0 : i32, i32
  }
  func.func @transform_3(%arg0: i32, %arg1: i32) -> (i32, i32) {
    %c0_i32 = arith.constant 0 : i32
    %c0_i32_0 = arith.constant 0 : i32
    %c0_i32_1 = arith.constant 0 : i32
    return %c0_i32, %c0_i32_0 : i32, i32
  }
  func.func @transform_4(%arg0: i32, %arg1: i32) -> (i32, i32, i32) {
    %c0_i32 = arith.constant 0 : i32
    %c0_i32_0 = arith.constant 0 : i32
    return %arg0, %arg1, %c0_i32 : i32, i32, i32
  }
}

module attributes {stable_mosaic.version = 11 : i64} {
  func.func @_mm_bn_proj_kernel(%arg0: i32, %arg1: i32, %arg2: memref<64x4xbf16, #tpu.memory_space<vmem>>, %arg3: memref<4x16xbf16, #tpu.memory_space<vmem>>, %arg4: memref<1x16xf32, #tpu.memory_space<vmem>>, %arg5: memref<1x16xf32, #tpu.memory_space<vmem>>, %arg6: memref<64x4xf32, #tpu.memory_space<vmem>>, %arg7: memref<4x16xbf16, #tpu.memory_space<vmem>>, %arg8: memref<1x16xf32, #tpu.memory_space<vmem>>, %arg9: memref<1x16xf32, #tpu.memory_space<vmem>>, %arg10: memref<64x16xbf16, #tpu.memory_space<vmem>>) attributes {dimension_semantics = [#tpu.dimension_semantics<parallel>, #tpu.dimension_semantics<parallel>], iteration_bounds = array<i64: 2, 1>, scalar_prefetch = 0 : i64, scratch_operands = 0 : i64, tpu.core_type = #tpu.core_type<tc>, window_params = [{transform_indices = @transform_0, window_bounds = array<i64: 64, 4>}, {transform_indices = @transform_1, window_bounds = array<i64: 4, 16>}, {transform_indices = @transform_2, window_bounds = array<i64: 1, 16>}, {transform_indices = @transform_3, window_bounds = array<i64: 1, 16>}, {transform_indices = @transform_4, window_bounds = array<i64: 64, 4>}, {transform_indices = @transform_5, window_bounds = array<i64: 4, 16>}, {transform_indices = @transform_6, window_bounds = array<i64: 1, 16>}, {transform_indices = @transform_7, window_bounds = array<i64: 1, 16>}, {transform_indices = @transform_8, window_bounds = array<i64: 64, 16>}]} {
    %c0 = arith.constant 0 : index
    %c0_0 = arith.constant 0 : index
    %0 = vector.load %arg2[%c0, %c0_0] : memref<64x4xbf16, #tpu.memory_space<vmem>>, vector<64x4xbf16>
    %c0_1 = arith.constant 0 : index
    %c0_2 = arith.constant 0 : index
    %1 = vector.load %arg3[%c0_1, %c0_2] : memref<4x16xbf16, #tpu.memory_space<vmem>>, vector<4x16xbf16>
    %cst = arith.constant dense<0.000000e+00> : vector<64x16xf32>
    %2 = tpu.matmul %0, %1, %cst {dimension_numbers = #tpu.dot_dimension_numbers<[1], [0], [0], [1], [0, 0, 1, 1], [], []>} : vector<64x4xbf16>, vector<4x16xbf16>, vector<64x16xf32> -> vector<64x16xf32>
    %c0_3 = arith.constant 0 : index
    %c0_4 = arith.constant 0 : index
    %3 = vector.load %arg4[%c0_3, %c0_4] : memref<1x16xf32, #tpu.memory_space<vmem>>, vector<1x16xf32>
    %4 = vector.broadcast %3 : vector<1x16xf32> to vector<64x16xf32>
    %5 = arith.mulf %2, %4 : vector<64x16xf32>
    %c0_5 = arith.constant 0 : index
    %c0_6 = arith.constant 0 : index
    %6 = vector.load %arg5[%c0_5, %c0_6] : memref<1x16xf32, #tpu.memory_space<vmem>>, vector<1x16xf32>
    %7 = vector.broadcast %6 : vector<1x16xf32> to vector<64x16xf32>
    %8 = arith.addf %5, %7 : vector<64x16xf32>
    %c0_7 = arith.constant 0 : index
    %c0_8 = arith.constant 0 : index
    %9 = vector.load %arg6[%c0_7, %c0_8] : memref<64x4xf32, #tpu.memory_space<vmem>>, vector<64x4xf32>
    %10 = arith.truncf %9 : vector<64x4xf32> to vector<64x4xbf16>
    %c0_9 = arith.constant 0 : index
    %c0_10 = arith.constant 0 : index
    %11 = vector.load %arg7[%c0_9, %c0_10] : memref<4x16xbf16, #tpu.memory_space<vmem>>, vector<4x16xbf16>
    %cst_11 = arith.constant dense<0.000000e+00> : vector<64x16xf32>
    %12 = tpu.matmul %10, %11, %cst_11 {dimension_numbers = #tpu.dot_dimension_numbers<[1], [0], [0], [1], [0, 0, 1, 1], [], []>} : vector<64x4xbf16>, vector<4x16xbf16>, vector<64x16xf32> -> vector<64x16xf32>
    %c0_12 = arith.constant 0 : index
    %c0_13 = arith.constant 0 : index
    %13 = vector.load %arg8[%c0_12, %c0_13] : memref<1x16xf32, #tpu.memory_space<vmem>>, vector<1x16xf32>
    %14 = vector.broadcast %13 : vector<1x16xf32> to vector<64x16xf32>
    %15 = arith.mulf %12, %14 : vector<64x16xf32>
    %16 = arith.addf %8, %15 : vector<64x16xf32>
    %c0_14 = arith.constant 0 : index
    %c0_15 = arith.constant 0 : index
    %17 = vector.load %arg9[%c0_14, %c0_15] : memref<1x16xf32, #tpu.memory_space<vmem>>, vector<1x16xf32>
    %18 = vector.broadcast %17 : vector<1x16xf32> to vector<64x16xf32>
    %19 = arith.addf %16, %18 : vector<64x16xf32>
    %cst_16 = arith.constant 0.000000e+00 : f32
    %20 = vector.broadcast %cst_16 : f32 to vector<64x16xf32>
    %21 = arith.maximumf %19, %20 : vector<64x16xf32>
    %22 = arith.truncf %21 : vector<64x16xf32> to vector<64x16xbf16>
    %c0_17 = arith.constant 0 : index
    %c0_18 = arith.constant 0 : index
    %23 = vector.load %arg10[%c0_17, %c0_18] : memref<64x16xbf16, #tpu.memory_space<vmem>>, vector<64x16xbf16>
    tpu.vector_store %arg10[%c0_17, %c0_18], %22 {strides = array<i32>} : memref<64x16xbf16, #tpu.memory_space<vmem>>, vector<64x16xbf16>,
    return
  }
  func.func @transform_0(%arg0: i32, %arg1: i32) -> (i32, i32) {
    %c0_i32 = arith.constant 0 : i32
    %c0_i32_0 = arith.constant 0 : i32
    return %arg0, %c0_i32 : i32, i32
  }
  func.func @transform_1(%arg0: i32, %arg1: i32) -> (i32, i32) {
    %c0_i32 = arith.constant 0 : i32
    %c0_i32_0 = arith.constant 0 : i32
    return %c0_i32, %arg1 : i32, i32
  }
  func.func @transform_2(%arg0: i32, %arg1: i32) -> (i32, i32) {
    %c0_i32 = arith.constant 0 : i32
    %c0_i32_0 = arith.constant 0 : i32
    return %c0_i32, %arg1 : i32, i32
  }
  func.func @transform_3(%arg0: i32, %arg1: i32) -> (i32, i32) {
    %c0_i32 = arith.constant 0 : i32
    %c0_i32_0 = arith.constant 0 : i32
    return %c0_i32, %arg1 : i32, i32
  }
  func.func @transform_4(%arg0: i32, %arg1: i32) -> (i32, i32) {
    %c0_i32 = arith.constant 0 : i32
    %c0_i32_0 = arith.constant 0 : i32
    return %arg0, %c0_i32 : i32, i32
  }
  func.func @transform_5(%arg0: i32, %arg1: i32) -> (i32, i32) {
    %c0_i32 = arith.constant 0 : i32
    %c0_i32_0 = arith.constant 0 : i32
    return %c0_i32, %arg1 : i32, i32
  }
  func.func @transform_6(%arg0: i32, %arg1: i32) -> (i32, i32) {
    %c0_i32 = arith.constant 0 : i32
    %c0_i32_0 = arith.constant 0 : i32
    return %c0_i32, %arg1 : i32, i32
  }
  func.func @transform_7(%arg0: i32, %arg1: i32) -> (i32, i32) {
    %c0_i32 = arith.constant 0 : i32
    %c0_i32_0 = arith.constant 0 : i32
    return %c0_i32, %arg1 : i32, i32
  }
  func.func @transform_8(%arg0: i32, %arg1: i32) -> (i32, i32) {
    %c0_i32 = arith.constant 0 : i32
    return %arg0, %arg1 : i32, i32
  }
}

</mosaic_0001>

<bundles_post_ra>
// kernel: bottleneck_forward.3
= control target key start
LH: loop header
LB: loop body
LE: loop exit
PB: predicated region body
PF: predicated region fallthrough
CT: control target
= control target key end

     0   :  { %s1139_s15 = smov 0   ;;  %s1141_s16 = smov 0   ;;  %s1369_s0 = inlined_call_operand.vmem [shape: f32[512,4], index: 0, kind: input, shape index: {}]   ;;  %s1370_s1 = inlined_call_operand.vmem [shape: bf16[4,4], index: 1, kind: input, shape index: {}]   ;;  %s1371_s2 = inlined_call_operand.vmem [shape: f32[1,4], index: 2, kind: input, shape index: {}]   ;;  %s1372_s3 = inlined_call_operand.vmem [shape: f32[1,4], index: 3, kind: input, shape index: {}]   ;;  %s1373_s4 = inlined_call_operand.vmem [shape: bf16[512,4], index: 4, kind: output, shape index: {}]  }
   0x1   :  { %s1143_s17 = smov 0  }
   0x2 LB: > { %s26_s18 = sadd.s32 1, %s1108_s16  ;;  %p922_p0 = scmp.ge.s32.totalorder %s1112_s17, 1  ;;  %s1112_s17 = sphi %s1143_s17, %s14_s17   ;;  %s1108_s16 = sphi %s1141_s16, %s1375_s16   ;;  %s1104_s15 = sphi %s1139_s15, %s1374_s15  }
   0x3   : > { %p28_p1 = scmp.ge.s32.totalorder %s26_s18, 2  ;;  %p202_p2 = scmp.lt.s32.totalorder %s1112_s17, 3 }
   0x5   : > { %s1377_s18 = smov (%p28_p1, %s26_s18), 0  ;;  %p203_p3 = pnand %p922_p0, %p202_p2 }
   0x6   : > { %v315_v0 = vld [vmem:[%s1370_s1] sm:$0x3] (!%p203_p3)  ;;  %vm365_vm0 = vcmask (!%p203_p3), 1041408   ;;  %s923_s21 = sshll.u32 (!%p203_p3), %s1104_s15, 5  ;;  %vm316_vm1 = vcmask (!%p203_p3), 31744   ;;  %vm768_vm2 = vcmask (!%p203_p3), 27648  }
   0x7   : > { %206 = sbr.rel (%p203_p3) target bundleno = 272 (0x110), region = 36  ;;  %1064 = vmatprep.subr.msk.bf16.mxu0 (!%p203_p3), %vm365_vm0, %v315_v0  ;;  %1065 = vmatprep.subr.msk.bf16.mxu1 (!%p203_p3), %vm365_vm0, %v315_v0  ;;  %v367_v1 = vsel (!%p203_p3), %vm365_vm0, %v315_v0, 0  ;;  %p242_p4 = scmp.lt.s32.totalorder (!%p203_p3), %s923_s21, 63  ;;  %v1219_v50 = vld [vmem:[%s1371_s2] ss:$0 sm:$0xff] (!%p203_p3) }
   0x8   : > { %1029 = vmatpush3.bf16.msra.mxu0 (!%p203_p3), %v367_v1  ;;  %1063 = vmatpush3.bf16.msra.mxu1 (!%p203_p3), %v367_v1  ;;  %v1224_v52 = vld [vmem:[%s1372_s3] ss:$0 sm:$0xff] (!%p203_p3) }
   0xe   : > { %s1379_s21 = smov (!%p242_p4, %s923_s21), 63 }
   0xf   : > { %s924_s22 = sshll.u32 %s1379_s21, 3  ;;  %s926_s30 = sshll.u32 %s1379_s21, 2 }
  0x10   : > { %s1166_s25 = scalar_lea.vmem %s1369_s0, %s924_s22  ;;  %s1243_s7 = scalar_lea.vmem %s1373_s4, %s926_s30 }
  0x11   : > { %v267_v2 = vld [vmem:[%s1166_s25] sm:$0xff]  ;;  %v268_v3 = vld [vmem:[%s1166_s25 + $0x8] sm:$0xff]  ;;  %v269_v7 = vld [vmem:[%s1166_s25 + $0x10] sm:$0xff] }
  0x12   : > { %v283_v4 = vld [vmem:[%s1166_s25 + $0x80] sm:$0xff]  ;;  %v299_v5 = vpack.c.bf16 %v268_v3, %v267_v2  ;;  %v284_v6 = vld [vmem:[%s1166_s25 + $0x88] sm:$0xff]  ;;  %v270_v8 = vld [vmem:[%s1166_s25 + $0x18] sm:$0xff] }
  0x13   : > { %v307_v9 = vpack.c.bf16 %v284_v6, %v283_v4  ;;  %v300_v10 = vpack.c.bf16 %v270_v8, %v269_v7  ;;  %v285_v11 = vld [vmem:[%s1166_s25 + $0x90] sm:$0xff]  ;;  %v286_v12 = vld [vmem:[%s1166_s25 + $0x98] sm:$0xff]  ;;  %v271_v13 = vld [vmem:[%s1166_s25 + $0x20] sm:$0xff] }
  0x14   : > { %1030 = vmatprep.mubr.msk.bf16.mxu0 %vm316_vm1, %v299_v5  ;;  %v308_v14 = vpack.c.bf16 %v286_v12, %v285_v11  ;;  %v272_v15 = vld [vmem:[%s1166_s25 + $0x28] sm:$0xff]  ;;  %v287_v16 = vld [vmem:[%s1166_s25 + $0xa0] sm:$0xff]  ;;  %v273_v20 = vld [vmem:[%s1166_s25 + $0x30] sm:$0xff] }
  0x15   : > { %v288_v17 = vld [vmem:[%s1166_s25 + $0xa8] sm:$0xff]  ;;  %1046 = vmatprep.mubr.msk.bf16.mxu1 %vm316_vm1, %v307_v9  ;;  %1031 = vmatmul.mubr.msk.bf16.vlgmr.msra.gmra.mrb[0].mxu0 %vm316_vm1, %v300_v10  ;;  %v301_v18 = vpack.c.bf16 %v272_v15, %v271_v13  ;;  %v274_v21 = vld [vmem:[%s1166_s25 + $0x38] sm:$0xff]  ;;  %v289_v22 = vld [vmem:[%s1166_s25 + $0xb0] sm:$0xff] }
  0x16   : > { %v309_v19 = vpack.c.bf16 %v288_v17, %v287_v16  ;;  %1047 = vmatmul.mubr.msk.bf16.vlgmr.msra.gmra.mrb[0].mxu1 %vm316_vm1, %v308_v14  ;;  %v290_v23 = vld [vmem:[%s1166_s25 + $0xb8] sm:$0xff]  ;;  %v275_v24 = vld [vmem:[%s1166_s25 + $0x40] sm:$0xff]  ;;  %v276_v25 = vld [vmem:[%s1166_s25 + $0x48] sm:$0xff]  ;;  %v302_v28 = vpack.c.bf16 %v274_v21, %v273_v20 }
  0x17   : > { %1034 = vmatprep.mubr.msk.bf16.mxu0 %vm316_vm1, %v301_v18  ;;  %v291_v26 = vld [vmem:[%s1166_s25 + $0xc0] sm:$0xff]  ;;  %v292_v27 = vld [vmem:[%s1166_s25 + $0xc8] sm:$0xff]  ;;  %v310_v29 = vpack.c.bf16 %v290_v23, %v289_v22  ;;  %v303_v30 = vpack.c.bf16 %v276_v25, %v275_v24  ;;  %v277_v32 = vld [vmem:[%s1166_s25 + $0x50] sm:$0xff] }
  0x18   : > { %1050 = vmatprep.mubr.msk.bf16.mxu1 %vm316_vm1, %v309_v19  ;;  %v311_v31 = vpack.c.bf16 %v292_v27, %v291_v26  ;;  %v278_v33 = vld [vmem:[%s1166_s25 + $0x58] sm:$0xff]  ;;  %v293_v34 = vld [vmem:[%s1166_s25 + $0xd0] sm:$0xff]  ;;  %v279_v36 = vld [vmem:[%s1166_s25 + $0x60] sm:$0xff] }
  0x19   : > { %v294_v35 = vld [vmem:[%s1166_s25 + $0xd8] sm:$0xff]  ;;  %v280_v37 = vld [vmem:[%s1166_s25 + $0x68] sm:$0xff]  ;;  %v295_v38 = vld [vmem:[%s1166_s25 + $0xe0] sm:$0xff]  ;;  %v304_v40 = vpack.c.bf16 %v278_v33, %v277_v32 }
  0x1a   : > { %v296_v39 = vld [vmem:[%s1166_s25 + $0xe8] sm:$0xff]  ;;  %v312_v41 = vpack.c.bf16 %v294_v35, %v293_v34  ;;  %v305_v42 = vpack.c.bf16 %v280_v37, %v279_v36  ;;  %v281_v44 = vld [vmem:[%s1166_s25 + $0x70] sm:$0xff]  ;;  %v282_v45 = vld [vmem:[%s1166_s25 + $0x78] sm:$0xff] }
  0x1b   : > { %v313_v43 = vpack.c.bf16 %v296_v39, %v295_v38  ;;  %v297_v46 = vld [vmem:[%s1166_s25 + $0xf0] sm:$0xff]  ;;  %v298_v47 = vld [vmem:[%s1166_s25 + $0xf8] sm:$0xff]  ;;  %v306_v48 = vpack.c.bf16 %v282_v45, %v281_v44 }
  0x1c   : > { %v314_v49 = vpack.c.bf16 %v298_v47, %v297_v46 }
  0x1d   : > { %1035 = vmatmul.mubr.msk.bf16.gmra.mrb[4].mxu0 %vm316_vm1, %v302_v28 }
  0x1e   : > { %1051 = vmatmul.mubr.msk.bf16.gmra.mrb[4].mxu1 %vm316_vm1, %v310_v29  ;;  %1038 = vmatprep.mubr.msk.bf16.mxu0 %vm316_vm1, %v303_v30 }
  0x1f   : > { %1054 = vmatprep.mubr.msk.bf16.mxu1 %vm316_vm1, %v311_v31 }
  0x25   : > { %1039 = vmatmul.mubr.msk.bf16.gmra.mrb[8].mxu0 %vm316_vm1, %v304_v40 }
  0x26   : > { %1055 = vmatmul.mubr.msk.bf16.gmra.mrb[8].mxu1 %vm316_vm1, %v312_v41  ;;  %1042 = vmatprep.mubr.msk.bf16.mxu0 %vm316_vm1, %v305_v42 }
  0x27   : > { %1058 = vmatprep.mubr.msk.bf16.mxu1 %vm316_vm1, %v313_v43 }
  0x2d   : > { %1043 = vmatmul.mubr.msk.bf16.gmra.mrb[12].mxu0 %vm316_vm1, %v306_v48 }
  0x2e   : > { %1059 = vmatmul.mubr.msk.bf16.gmra.mrb[12].mxu1 %vm316_vm1, %v314_v49 }
  0xe8   : > { %v1032_v51 = vpop.f32.mrb[0].mxu0 }
  0xe9   : > { %v539_v53 = vmul.f32 %v1032_v51, %v1219_v50  ;;  %v1048_v54 = vpop.f32.mrb[0].mxu1  ;;  %v403_v55 = vpop.f32.mrb[1].mxu0 }
  0xea   : > { %v555_v56 = vmul.f32 %v1048_v54, %v1219_v50  ;;  %v537_v57 = vmul.f32 %v1219_v50, %v403_v55  ;;  %v467_v58 = vpop.f32.mrb[1].mxu1  ;;  %v1033_v59 = vpop.f32.mrb[2].mxu0 }
  0xeb   : > { %v578_v60 = vadd.f32 %v1224_v52, %v539_v53  ;;  %v553_v61 = vmul.f32 %v1219_v50, %v467_v58  ;;  %v540_v62 = vmul.f32 %v1033_v59, %v1219_v50  ;;  %v1049_v63 = vpop.f32.mrb[2].mxu1  ;;  %v406_v0 = vpop.f32.mrb[3].mxu0 }
  0xec   : > { %v594_v1 = vadd.f32 %v1224_v52, %v555_v56  ;;  %v576_v2 = vadd.f32 %v1224_v52, %v537_v57  ;;  %v556_v3 = vmul.f32 %v1049_v63, %v1219_v50  ;;  %v538_v4 = vmul.f32 %v1219_v50, %v406_v0  ;;  %v470_v5 = vpop.f32.mrb[3].mxu1 }
  0xed   : > { %v610_v6 = vmax.f32 %v578_v60, 0.0  ;;  %v592_v7 = vadd.f32 %v1224_v52, %v553_v61  ;;  %v579_v8 = vadd.f32 %v1224_v52, %v540_v62  ;;  %v554_v9 = vmul.f32 %v1219_v50, %v470_v5 }
  0xee   : > { %v626_v10 = vmax.f32 %v594_v1, 0.0  ;;  %v608_v11 = vmax.f32 %v576_v2, 0.0  ;;  %v595_v12 = vadd.f32 %v1224_v52, %v556_v3  ;;  %v577_v13 = vadd.f32 %v1224_v52, %v538_v4 }
  0xef   : > { %v981_v14 = vpack.c.bf16 %v610_v6, %v610_v6  ;;  %v624_v15 = vmax.f32 %v592_v7, 0.0  ;;  %v611_v16 = vmax.f32 %v579_v8, 0.0  ;;  %v593_v17 = vadd.f32 %v1224_v52, %v554_v9 }
  0xf0   : > { %v997_v18 = vpack.c.bf16 %v626_v10, %v626_v10  ;;  %v979_v19 = vpack.c.bf16 %v608_v11, %v608_v11  ;;  %v627_v20 = vmax.f32 %v595_v12, 0.0  ;;  %v609_v21 = vmax.f32 %v577_v13, 0.0  ;;  %v1036_v22 = vpop.f32.mrb[4].mxu0 }
  0xf1   : > { %771 = vst.msk [vmem:[%s1243_s7 + $0x8] sm:$0xf] %vm768_vm2, %v981_v14  ;;  %v995_v23 = vpack.c.bf16 %v624_v15, %v624_v15  ;;  %v982_v24 = vpack.c.bf16 %v611_v16, %v611_v16  ;;  %v625_v25 = vmax.f32 %v593_v17, 0.0  ;;  %v543_v26 = vmul.f32 %v1036_v22, %v1219_v50  ;;  %v1052_v27 = vpop.f32.mrb[4].mxu1  ;;  %v419_v28 = vpop.f32.mrb[5].mxu0 }
  0xf2   : > { %787 = vst.msk [vmem:[%s1243_s7 + $0x48] sm:$0xf] %vm768_vm2, %v997_v18  ;;  %769 = vst.msk [vmem:[%s1243_s7] sm:$0xf] %vm768_vm2, %v979_v19  ;;  %v998_v29 = vpack.c.bf16 %v627_v20, %v627_v20  ;;  %v980_v30 = vpack.c.bf16 %v609_v21, %v609_v21  ;;  %v559_v31 = vmul.f32 %v1052_v27, %v1219_v50  ;;  %v483_v33 = vpop.f32.mrb[5].mxu1  ;;  %v1037_v34 = vpop.f32.mrb[6].mxu0 }
  0xf3   : > { %v541_v32 = vmul.f32 %v1219_v50, %v419_v28  ;;  %785 = vst.msk [vmem:[%s1243_s7 + $0x40] sm:$0xf] %vm768_vm2, %v995_v23  ;;  %772 = vst.msk [vmem:[%s1243_s7 + $0xc] sm:$0xf] %vm768_vm2, %v982_v24  ;;  %v996_v35 = vpack.c.bf16 %v625_v25, %v625_v25  ;;  %v582_v36 = vadd.f32 %v1224_v52, %v543_v26  ;;  %v1053_v39 = vpop.f32.mrb[6].mxu1  ;;  %v422_v40 = vpop.f32.mrb[7].mxu0 }
  0xf4   : > { %v557_v37 = vmul.f32 %v1219_v50, %v483_v33  ;;  %v544_v38 = vmul.f32 %v1037_v34, %v1219_v50  ;;  %788 = vst.msk [vmem:[%s1243_s7 + $0x4c] sm:$0xf] %vm768_vm2, %v998_v29  ;;  %770 = vst.msk [vmem:[%s1243_s7 + $0x4] sm:$0xf] %vm768_vm2, %v980_v30  ;;  %v598_v41 = vadd.f32 %v1224_v52, %v559_v31  ;;  %v486_v45 = vpop.f32.mrb[7].mxu1 }
  0xf5   : > { %v580_v42 = vadd.f32 %v1224_v52, %v541_v32  ;;  %v560_v43 = vmul.f32 %v1053_v39, %v1219_v50  ;;  %v542_v44 = vmul.f32 %v1219_v50, %v422_v40  ;;  %786 = vst.msk [vmem:[%s1243_s7 + $0x44] sm:$0xf] %vm768_vm2, %v996_v35  ;;  %v614_v46 = vmax.f32 %v582_v36, 0.0 }
  0xf6   : > { %v596_v47 = vadd.f32 %v1224_v52, %v557_v37  ;;  %v583_v48 = vadd.f32 %v1224_v52, %v544_v38  ;;  %v558_v49 = vmul.f32 %v1219_v50, %v486_v45  ;;  %v630_v51 = vmax.f32 %v598_v41, 0.0 }
  0xf7   : > { %v612_v53 = vmax.f32 %v580_v42, 0.0  ;;  %v599_v54 = vadd.f32 %v1224_v52, %v560_v43  ;;  %v581_v55 = vadd.f32 %v1224_v52, %v542_v44  ;;  %v985_v56 = vpack.c.bf16 %v614_v46, %v614_v46 }
  0xf8   : > { %v628_v57 = vmax.f32 %v596_v47, 0.0  ;;  %v615_v58 = vmax.f32 %v583_v48, 0.0  ;;  %v597_v59 = vadd.f32 %v1224_v52, %v558_v49  ;;  %v1001_v60 = vpack.c.bf16 %v630_v51, %v630_v51  ;;  %v1040_v0 = vpop.f32.mrb[8].mxu0 }
  0xf9   : > { %v983_v61 = vpack.c.bf16 %v612_v53, %v612_v53  ;;  %v631_v62 = vmax.f32 %v599_v54, 0.0  ;;  %v613_v63 = vmax.f32 %v581_v55, 0.0  ;;  %775 = vst.msk [vmem:[%s1243_s7 + $0x18] sm:$0xf] %vm768_vm2, %v985_v56  ;;  %v547_v4 = vmul.f32 %v1040_v0, %v1219_v50  ;;  %v1056_v5 = vpop.f32.mrb[8].mxu1  ;;  %v435_v6 = vpop.f32.mrb[9].mxu0 }
  0xfa   : > { %v999_v1 = vpack.c.bf16 %v628_v57, %v628_v57  ;;  %v986_v2 = vpack.c.bf16 %v615_v58, %v615_v58  ;;  %v629_v3 = vmax.f32 %v597_v59, 0.0  ;;  %791 = vst.msk [vmem:[%s1243_s7 + $0x58] sm:$0xf] %vm768_vm2, %v1001_v60  ;;  %v563_v9 = vmul.f32 %v1056_v5, %v1219_v50  ;;  %v499_v11 = vpop.f32.mrb[9].mxu1  ;;  %v1041_v12 = vpop.f32.mrb[10].mxu0 }
  0xfb   : > { %773 = vst.msk [vmem:[%s1243_s7 + $0x10] sm:$0xf] %vm768_vm2, %v983_v61  ;;  %v1002_v7 = vpack.c.bf16 %v631_v62, %v631_v62  ;;  %v984_v8 = vpack.c.bf16 %v613_v63, %v613_v63  ;;  %v545_v10 = vmul.f32 %v1219_v50, %v435_v6  ;;  %v586_v14 = vadd.f32 %v1224_v52, %v547_v4  ;;  %v1057_v17 = vpop.f32.mrb[10].mxu1  ;;  %v438_v18 = vpop.f32.mrb[11].mxu0 }
  0xfc   : > { %789 = vst.msk [vmem:[%s1243_s7 + $0x50] sm:$0xf] %vm768_vm2, %v999_v1  ;;  %776 = vst.msk [vmem:[%s1243_s7 + $0x1c] sm:$0xf] %vm768_vm2, %v986_v2  ;;  %v1000_v13 = vpack.c.bf16 %v629_v3, %v629_v3  ;;  %v561_v15 = vmul.f32 %v1219_v50, %v499_v11  ;;  %v548_v16 = vmul.f32 %v1041_v12, %v1219_v50  ;;  %v502_v23 = vpop.f32.mrb[11].mxu1 }
  0xfd   : > { %792 = vst.msk [vmem:[%s1243_s7 + $0x5c] sm:$0xf] %vm768_vm2, %v1002_v7  ;;  %774 = vst.msk [vmem:[%s1243_s7 + $0x14] sm:$0xf] %vm768_vm2, %v984_v8  ;;  %v602_v19 = vadd.f32 %v1224_v52, %v563_v9  ;;  %v584_v20 = vadd.f32 %v1224_v52, %v545_v10  ;;  %v564_v21 = vmul.f32 %v1057_v17, %v1219_v50  ;;  %v618_v24 = vmax.f32 %v586_v14, 0.0 }
  0xfe   : > { %v546_v22 = vmul.f32 %v1219_v50, %v438_v18  ;;  %790 = vst.msk [vmem:[%s1243_s7 + $0x54] sm:$0xf] %vm768_vm2, %v1000_v13  ;;  %v600_v25 = vadd.f32 %v1224_v52, %v561_v15  ;;  %v587_v26 = vadd.f32 %v1224_v52, %v548_v16  ;;  %v562_v27 = vmul.f32 %v1219_v50, %v502_v23 }
  0xff   : > { %v634_v28 = vmax.f32 %v602_v19, 0.0  ;;  %v616_v29 = vmax.f32 %v584_v20, 0.0  ;;  %v603_v30 = vadd.f32 %v1224_v52, %v564_v21  ;;  %v989_v32 = vpack.c.bf16 %v618_v24, %v618_v24 }
 0x100   : > { %v585_v31 = vadd.f32 %v1224_v52, %v546_v22  ;;  %v632_v33 = vmax.f32 %v600_v25, 0.0  ;;  %v619_v34 = vmax.f32 %v587_v26, 0.0  ;;  %v601_v35 = vadd.f32 %v1224_v52, %v562_v27  ;;  %v1044_v40 = vpop.f32.mrb[12].mxu0 }
 0x101   : > { %v1005_v36 = vpack.c.bf16 %v634_v28, %v634_v28  ;;  %v987_v37 = vpack.c.bf16 %v616_v29, %v616_v29  ;;  %v635_v38 = vmax.f32 %v603_v30, 0.0  ;;  %779 = vst.msk [vmem:[%s1243_s7 + $0x28] sm:$0xf] %vm768_vm2, %v989_v32  ;;  %v551_v44 = vmul.f32 %v1044_v40, %v1219_v50  ;;  %v1060_v45 = vpop.f32.mrb[12].mxu1  ;;  %v451_v46 = vpop.f32.mrb[13].mxu0 }
 0x102   : > { %v617_v39 = vmax.f32 %v585_v31, 0.0  ;;  %v1003_v41 = vpack.c.bf16 %v632_v33, %v632_v33  ;;  %v990_v42 = vpack.c.bf16 %v619_v34, %v619_v34  ;;  %v633_v43 = vmax.f32 %v601_v35, 0.0  ;;  %v515_v53 = vpop.f32.mrb[13].mxu1  ;;  %v1045_v54 = vpop.f32.mrb[14].mxu0 }
 0x103   : > { %795 = vst.msk [vmem:[%s1243_s7 + $0x68] sm:$0xf] %vm768_vm2, %v1005_v36  ;;  %777 = vst.msk [vmem:[%s1243_s7 + $0x20] sm:$0xf] %vm768_vm2, %v987_v37  ;;  %v1006_v47 = vpack.c.bf16 %v635_v38, %v635_v38  ;;  %v567_v49 = vmul.f32 %v1060_v45, %v1219_v50  ;;  %v549_v51 = vmul.f32 %v1219_v50, %v451_v46  ;;  %v1061_v59 = vpop.f32.mrb[14].mxu1  ;;  %v454_v60 = vpop.f32.mrb[15].mxu0 }
 0x104   : > { %v988_v48 = vpack.c.bf16 %v617_v39, %v617_v39  ;;  %793 = vst.msk [vmem:[%s1243_s7 + $0x60] sm:$0xf] %vm768_vm2, %v1003_v41  ;;  %780 = vst.msk [vmem:[%s1243_s7 + $0x2c] sm:$0xf] %vm768_vm2, %v990_v42  ;;  %v1004_v55 = vpack.c.bf16 %v633_v43, %v633_v43  ;;  %v590_v56 = vadd.f32 %v1224_v52, %v551_v44  ;;  %v518_v1 = vpop.f32.mrb[15].mxu1 }
 0x105   : > { %v565_v57 = vmul.f32 %v1219_v50, %v515_v53  ;;  %v552_v58 = vmul.f32 %v1045_v54, %v1219_v50  ;;  %796 = vst.msk [vmem:[%s1243_s7 + $0x6c] sm:$0xf] %vm768_vm2, %v1006_v47  ;;  %v606_v61 = vadd.f32 %v1224_v52, %v567_v49  ;;  %v588_v62 = vadd.f32 %v1224_v52, %v549_v51 }
 0x106   : > { %778 = vst.msk [vmem:[%s1243_s7 + $0x24] sm:$0xf] %vm768_vm2, %v988_v48  ;;  %v568_v63 = vmul.f32 %v1061_v59, %v1219_v50  ;;  %v550_v0 = vmul.f32 %v1219_v50, %v454_v60  ;;  %794 = vst.msk [vmem:[%s1243_s7 + $0x64] sm:$0xf] %vm768_vm2, %v1004_v55  ;;  %v622_v2 = vmax.f32 %v590_v56, 0.0  ;;  %v566_v5 = vmul.f32 %v1219_v50, %v518_v1 }
 0x107   : > { %v604_v3 = vadd.f32 %v1224_v52, %v565_v57  ;;  %v591_v4 = vadd.f32 %v1224_v52, %v552_v58  ;;  %v638_v6 = vmax.f32 %v606_v61, 0.0  ;;  %v620_v7 = vmax.f32 %v588_v62, 0.0 }
 0x108   : > { %v607_v8 = vadd.f32 %v1224_v52, %v568_v63  ;;  %v589_v9 = vadd.f32 %v1224_v52, %v550_v0  ;;  %v993_v10 = vpack.c.bf16 %v622_v2, %v622_v2  ;;  %v605_v13 = vadd.f32 %v1224_v52, %v566_v5 }
 0x109   : > { %v636_v11 = vmax.f32 %v604_v3, 0.0  ;;  %v623_v12 = vmax.f32 %v591_v4, 0.0  ;;  %v1009_v14 = vpack.c.bf16 %v638_v6, %v638_v6  ;;  %v991_v15 = vpack.c.bf16 %v620_v7, %v620_v7 }
 0x10a   : > { %v639_v50 = vmax.f32 %v607_v8, 0.0  ;;  %v621_v16 = vmax.f32 %v589_v9, 0.0  ;;  %783 = vst.msk [vmem:[%s1243_s7 + $0x38] sm:$0xf] %vm768_vm2, %v993_v10  ;;  %v637_v19 = vmax.f32 %v605_v13, 0.0 }
 0x10b   : > { %v1007_v17 = vpack.c.bf16 %v636_v11, %v636_v11  ;;  %v994_v18 = vpack.c.bf16 %v623_v12, %v623_v12  ;;  %799 = vst.msk [vmem:[%s1243_s7 + $0x78] sm:$0xf] %vm768_vm2, %v1009_v14  ;;  %781 = vst.msk [vmem:[%s1243_s7 + $0x30] sm:$0xf] %vm768_vm2, %v991_v15 }
 0x10c   : > { %v1010_v20 = vpack.c.bf16 %v639_v50, %v639_v50  ;;  %v992_v21 = vpack.c.bf16 %v621_v16, %v621_v16  ;;  %v1008_v52 = vpack.c.bf16 %v637_v19, %v637_v19 }
 0x10d   : > { %797 = vst.msk [vmem:[%s1243_s7 + $0x70] sm:$0xf] %vm768_vm2, %v1007_v17  ;;  %784 = vst.msk [vmem:[%s1243_s7 + $0x3c] sm:$0xf] %vm768_vm2, %v994_v18 }
 0x10e   : > { %800 = vst.msk [vmem:[%s1243_s7 + $0x7c] sm:$0xf] %vm768_vm2, %v1010_v20  ;;  %782 = vst.msk [vmem:[%s1243_s7 + $0x34] sm:$0xf] %vm768_vm2, %v992_v21 }
 0x10f   : > { %798 = vst.msk [vmem:[%s1243_s7 + $0x74] sm:$0xf] %vm768_vm2, %v1008_v52 }
 0x110 PF: > { %s14_s17 = sadd.s32 1, %s1112_s17   ;;  %s1374_s15 = smov %s1108_s16 }
 0x111   : > { %p11_p5 = scmp.ge.s32.totalorder %s14_s17, 4   ;;  %s1375_s16 = smov %s1377_s18 }
 0x113   :  { %13 = sbr.rel (!%p11_p5) target bundleno = 2 (0x2), region = 75 }

// kernel: bottleneck_forward.4
= control target key start
LH: loop header
LB: loop body
LE: loop exit
PB: predicated region body
PF: predicated region fallthrough
CT: control target
= control target key end

     0   :  { %s1801_s15 = smov 0   ;;  %s1803_s16 = smov 0   ;;  %s2115_s0 = inlined_call_operand.vmem [shape: bf16[2,4,9,9,4], index: 0, kind: input, shape index: {}]   ;;  %s2116_s1 = inlined_call_operand.vmem [shape: bf16[36,4], index: 1, kind: input, shape index: {}]   ;;  %s2117_s2 = inlined_call_operand.vmem [shape: f32[1,4], index: 2, kind: input, shape index: {}]   ;;  %s2118_s3 = inlined_call_operand.vmem [shape: f32[1,4], index: 3, kind: input, shape index: {}]   ;;  %s2119_s4 = inlined_call_operand.vmem [shape: bf16[2,64,4], index: 4, kind: output, shape index: {}]  }
   0x1   :  { %s1805_s17 = smov 0  }
   0x2 LB: > { %s26_s18 = sadd.s32 1, %s1767_s16  ;;  %p1435_p0 = scmp.ge.s32.totalorder %s1771_s17, 1  ;;  %s1771_s17 = sphi %s1805_s17, %s14_s17   ;;  %s1767_s16 = sphi %s1803_s16, %s2121_s16   ;;  %s1763_s15 = sphi %s1801_s15, %s2120_s15  }
   0x3   : > { %p28_p1 = scmp.ge.s32.totalorder %s26_s18, 2  ;;  %p176_p2 = scmp.lt.s32.totalorder %s1771_s17, 3 }
   0x5   : > { %s2123_s18 = smov (%p28_p1, %s26_s18), 0  ;;  %p177_p3 = pnand %p1435_p0, %p176_p2 }
   0x6   : > { %p206_p4 = scmp.lt.s32.totalorder (!%p177_p3), %s1763_s15, 1  ;;  %v657_v0 = vld [vmem:[%s2116_s1 + $0x8] sm:$0xf] (!%p177_p3)  ;;  %vm690_vm0 = vcmask (!%p177_p3), 1043456   ;;  %s1773_s25 = smov (!%p177_p3), 4   ;;  %vm1171_vm1 = vcmask (!%p177_p3), 1041408  }
   0x7   : > { %180 = sbr.rel (%p177_p3) target bundleno = 441 (0x1b9), region = 36  ;;  %1673 = vmatprep.subr.msk.bf16.mxu1 (!%p177_p3), %vm690_vm0, %v657_v0  ;;  %v692_v1 = vsel (!%p177_p3), %vm690_vm0, %v657_v0, 0  ;;  %s1774_s30 = smov (!%p177_p3), 8   ;;  %vm510_vm2 = vcmask (!%p177_p3), 31744   ;;  %vm535_vm3 = vcmask (!%p177_p3), 64512   ;;  %vm552_vm4 = vcmask (!%p177_p3), 97280  }
   0x8   : > { %1610 = vmatpush3.bf16.msra.mxu1 (!%p177_p3), %v692_v1  ;;  %s1775_s7 = smov (!%p177_p3), 12   ;;  %vm785_vm5 = vcmask (!%p177_p3), 130048   ;;  %vm1318_vm6 = vcmask (!%p177_p3), 27648  }
   0xe   : > { %s2125_s15 = smov (!%p206_p4, %s1763_s15), 1 }
   0xf   : > { %s1676_s21 = smul.u32 288, %s2125_s15  ;;  %s1580_s12 = sshll.u32 %s2125_s15, 5 }
  0x10   : > { %s2088_s19 = scalar_lea.vmem %s2119_s4, %s1580_s12 }
  0x11   : > { %s1830_s24 = scalar_lea.vmem %s2115_s0, %s1676_s21 }
  0x12   : > { %v1704_v2 = vld [vmem:[%s1830_s24 + $0x68] ss:$0 sps:$4 sm:$0xff]   ;;  %v1705_v3 = vld [vmem:[%s1830_s24 + $0x50] ss:$0 sps:$4 sm:$0xff]   ;;  %v1706_v4 = vld [vmem:[%s1830_s24 + $0x78] ss:$0 sps:$4 sm:$0xff]  }
  0x13   : > { %623 = vrot.lane.b32.xlu1 %v1704_v2, %s1773_s25  ;;  %v1837_v5 = vld [vmem:[%s1830_s24 + $0x90] sm:$0xf]  ;;  %617 = vrot.lane.b32.xlu0 %v1705_v3, %s1773_s25  ;;  %v1707_v6 = vld [vmem:[%s1830_s24 + $0x58] ss:$0 sps:$4 sm:$0xff]  }
  0x14   : > { %v1528_v7 = vld [vmem:[%s1830_s24 + $0x94] sm:$0x1]  ;;  %v1844_v9 = vld [vmem:[%s1830_s24 + $0x98] sm:$0xf]  ;;  %v1529_v10 = vld [vmem:[%s1830_s24 + $0x9c] sm:$0x1] }
  0x15   : > { %v1536_v8 = vcombine.low %v1837_v5, %v1528_v7  ;;  %v1709_v11 = vld [vmem:[%s1830_s24 + $0x60] ss:$0 sps:$4 sm:$0xff]   ;;  %v1537_v12 = vcombine.low %v1844_v9, %v1529_v10  ;;  %v1850_v13 = vld [vmem:[%s1830_s24 + $0xa8] sm:$0xf]  ;;  %v1531_v14 = vld [vmem:[%s1830_s24 + $0xac] sm:$0x1] }
  0x16   : > { %v1539_v17 = vcombine.low %v1850_v13, %v1531_v14  ;;  %v1856_v18 = vld [vmem:[%s1830_s24 + $0xa0] sm:$0xf]  ;;  %v1530_v19 = vld [vmem:[%s1830_s24 + $0xa4] sm:$0x1]  ;;  %v1862_v22 = vld [vmem:[%s1830_s24 + $0xb8] sm:$0xf] }
  0x17   : > { %627 = vrot.lane.b32.xlu1 %v1706_v4, %s1773_s25  ;;  %v923_v15 = vshrl.u32 %v1536_v8, 16  ;;  %v925_v16 = vshll.u32 %v1536_v8, 16  ;;  %619 = vrot.lane.b32.xlu0 %v1707_v6, %s1773_s25  ;;  %v932_v20 = vshll.u32 %v1537_v12, 16  ;;  %v1538_v21 = vcombine.low %v1856_v18, %v1530_v19  ;;  %v1533_v23 = vld [vmem:[%s1830_s24 + $0xbc] sm:$0x1] }
  0x18   : > { %v930_v25 = vshrl.u32 %v1537_v12, 16  ;;  %v946_v26 = vshll.u32 %v1539_v17, 16  ;;  %v1541_v27 = vcombine.low %v1862_v22, %v1533_v23  ;;  %v1867_v28 = vld [vmem:[%s1830_s24 + $0xb0] sm:$0xf]  ;;  %v1532_v31 = vld [vmem:[%s1830_s24 + $0xb4] sm:$0x1] }
  0x19   : > { %v927_v24 = vrot.slane %v925_v16, 1  ;;  %v934_v29 = vrot.slane %v932_v20, 1  ;;  %v939_v30 = vshll.u32 %v1538_v21, 16  ;;  %v1711_v33 = vld [vmem:[%s1830_s24 + $0x70] ss:$0 sps:$4 sm:$0xff]   ;;  %v937_v34 = vshrl.u32 %v1538_v21, 16 }
  0x1a   : > { %v1540_v36 = vcombine.low %v1867_v28, %v1532_v31  ;;  %v944_v38 = vshrl.u32 %v1539_v17, 16  ;;  %v948_v39 = vrot.slane %v946_v26, 1  ;;  %v960_v40 = vshll.u32 %v1541_v27, 16  ;;  %v1875_v41 = vld [vmem:[%s1830_s24 + $0xc8] sm:$0xf] }
  0x1b   : > { %v928_v32 = vor.u32 %v927_v24, %v923_v15  ;;  %621 = vrot.lane.b32.xlu0 %v1709_v11, %s1773_s25  ;;  %v941_v35 = vrot.slane %v939_v30, 1  ;;  %v935_v37 = vor.u32 %v934_v29, %v930_v25  ;;  %v1535_v43 = vld [vmem:[%s1830_s24 + $0xcc] sm:$0x1]  ;;  %v1879_v44 = vld [vmem:[%s1830_s24 + $0xc0] sm:$0xf]  ;;  %v958_v51 = vshrl.u32 %v1541_v27, 16 }
  0x1c   : > { %v953_v42 = vshll.u32 %v1540_v36, 16  ;;  %v1534_v45 = vld [vmem:[%s1830_s24 + $0xc4] sm:$0x1]  ;;  %v951_v47 = vshrl.u32 %v1540_v36, 16  ;;  %v949_v50 = vor.u32 %v948_v39, %v944_v38  ;;  %v962_v52 = vrot.slane %v960_v40, 1 }
  0x1d   : > { %978 = vrot.lane.b32.xlu1 %v928_v32, %s1773_s25  ;;  %v942_v46 = vor.u32 %v941_v35, %v937_v34  ;;  %v1542_v49 = vcombine.low %v1879_v44, %v1534_v45  ;;  %v1543_v53 = vcombine.low %v1875_v41, %v1535_v43  ;;  %v1887_v54 = vld [vmem:[%s1830_s24] sm:$0xf]  ;;  %v234_v55 = vld [vmem:[%s1830_s24 + $0x4] sm:$0x1]  ;;  %v1891_v56 = vld [vmem:[%s1830_s24 + $0x8] sm:$0xf] }
  0x1e   : > { %v955_v48 = vrot.slane %v953_v42, 1  ;;  %v235_v57 = vld [vmem:[%s1830_s24 + $0xc] sm:$0x1]  ;;  %v1455_v60 = vcombine.low %v1887_v54, %v234_v55  ;;  %v963_v61 = vor.u32 %v962_v52, %v958_v51  ;;  %v1899_v0 = vld [vmem:[%s1830_s24 + $0x10] sm:$0xf] }
  0x1f   : > { %625 = vrot.lane.b32.xlu0 %v1711_v33, %s1773_s25  ;;  %v967_v59 = vshll.u32 %v1542_v49, 16  ;;  %v974_v62 = vshll.u32 %v1543_v53, 16  ;;  %v1456_v63 = vcombine.low %v1891_v56, %v235_v57  ;;  %v236_v1 = vld [vmem:[%s1830_s24 + $0x14] sm:$0x1]  ;;  %v1903_v2 = vld [vmem:[%s1830_s24 + $0x18] sm:$0xf] }
  0x20   : > { %v956_v58 = vor.u32 %v955_v48, %v951_v47  ;;  %v237_v3 = vld [vmem:[%s1830_s24 + $0x1c] sm:$0x1]  ;;  %v1717_v4 = vld [vmem:[%s1830_s24 + $0x80] ss:$0 sps:$4 sm:$0xff]   ;;  %v965_v6 = vshrl.u32 %v1542_v49, 16  ;;  %v305_v8 = vshll.u32 %v1455_v60, 16  ;;  %v1457_v10 = vcombine.low %v1899_v0, %v236_v1 }
  0x21   : > { %980 = vrot.lane.b32.xlu1 %v935_v37, %s1773_s25  ;;  %v969_v7 = vrot.slane %v967_v59, 1  ;;  %v1716_v11 = vld [vmem:[%s1830_s24 + $0x88] ss:$0 sps:$4 sm:$0xff]   ;;  %v972_v12 = vshrl.u32 %v1543_v53, 16  ;;  %v976_v14 = vrot.slane %v974_v62, 1  ;;  %v312_v15 = vshll.u32 %v1456_v63, 16 }
  0x22   : > { %v1458_v16 = vcombine.low %v1903_v2, %v237_v3  ;;  %v303_v19 = vshrl.u32 %v1455_v60, 16  ;;  %v307_v20 = vrot.slane %v305_v8, 1  ;;  %v319_v21 = vshll.u32 %v1457_v10, 16  ;;  %v1447_v31 = vld [vmem:[%s1830_s24 + $0xc] sm:$0x1] }
  0x23   : > { %982 = vrot.lane.b32.xlu0 %v942_v46, %s1773_s25  ;;  %v970_v17 = vor.u32 %v969_v7, %v965_v6  ;;  %v977_v23 = vor.u32 %v976_v14, %v972_v12  ;;  %v310_v24 = vshrl.u32 %v1456_v63, 16  ;;  %v314_v25 = vrot.slane %v312_v15, 1  ;;  %v1448_v35 = vld [vmem:[%s1830_s24 + $0x14] sm:$0x1]  ;;  %v1439_v36 = vld [vmem:[%s1830_s24 + $0x8] sm:$0xf] }
  0x24   : > { %v326_v26 = vshll.u32 %v1458_v16, 16  ;;  %v308_v27 = vor.u32 %v307_v20, %v303_v19  ;;  %v317_v29 = vshrl.u32 %v1457_v10, 16  ;;  %v321_v30 = vrot.slane %v319_v21, 1  ;;  %v1450_v38 = vld [vmem:[%s1830_s24 + $0x24] sm:$0x1] }
  0x25   : > { %984 = vrot.lane.b32.xlu1 %v949_v50, %s1773_s25  ;;  %v315_v32 = vor.u32 %v314_v25, %v310_v24  ;;  %v324_v33 = vshrl.u32 %v1458_v16, 16  ;;  %v1471_v37 = vcombine.low %v1439_v36, %v1447_v31  ;;  %v1440_v40 = vld [vmem:[%s1830_s24 + $0x10] sm:$0xf]  ;;  %v1449_v42 = vld [vmem:[%s1830_s24 + $0x1c] sm:$0x1]  ;;  %v1463_v53 = vcombine.low %v1439_v36, %v1439_v36 }
  0x26   : > { %v328_v34 = vrot.slane %v326_v26, 1  ;;  %v322_v39 = vor.u32 %v321_v30, %v317_v29  ;;  %v1472_v45 = vcombine.low %v1440_v40, %v1448_v35  ;;  %v1442_v46 = vld [vmem:[%s1830_s24 + $0x20] sm:$0xf]  ;;  %v1441_v48 = vld [vmem:[%s1830_s24 + $0x18] sm:$0xf] }
  0x27   : > { %986 = vrot.lane.b32.xlu0 %v956_v58, %s1773_s25  ;;  %v1474_v47 = vcombine.low %v1442_v46, %v1450_v38  ;;  %v1018_v49 = vld [vmem:[%s2116_s1 + $0xc] sm:$0xf]  ;;  %v1473_v50 = vcombine.low %v1441_v48, %v1449_v42  ;;  %v441_v51 = vshll.u32 %v1471_v37, 16  ;;  %v1933_v55 = vld [vmem:[%s1830_s24 + $0x28] sm:$0xf]  ;;  %v439_v1 = vshrl.u32 %v1471_v37, 16 }
  0x28   : > { %v329_v43 = vor.u32 %v328_v34, %v324_v33  ;;  %1674 = vmatprep.subr.msk.bf16.mxu0 %vm690_vm0, %v1018_v49  ;;  %v1052_v52 = vsel %vm690_vm0, %v1018_v49, 0  ;;  %v239_v57 = vld [vmem:[%s1830_s24 + $0x2c] sm:$0x1]  ;;  %v1937_v58 = vld [vmem:[%s1830_s24 + $0x20] sm:$0xf]  ;;  %v448_v62 = vshll.u32 %v1472_v45, 16  ;;  %v1465_v8 = vcombine.low %v1441_v48, %v1441_v48 }
  0x29   : > { %988 = vrot.lane.b32.xlu1 %v963_v61, %s1773_s25  ;;  %v238_v59 = vld [vmem:[%s1830_s24 + $0x24] sm:$0x1]  ;;  %1630 = vmatpush3.bf16.msra.mxu0 %v1052_v52  ;;  %v1138_v60 = vld [vmem:[%s2116_s1 + $0x10] sm:$0x3]  ;;  %v1464_v61 = vcombine.low %v1440_v40, %v1440_v40  ;;  %v446_v63 = vshrl.u32 %v1472_v45, 16  ;;  %v462_v3 = vshll.u32 %v1474_v47, 16  ;;  %v1466_v12 = vcombine.low %v1442_v46, %v1442_v46 }
  0x2a   : > { %1675 = vmatprep.subr.msk.bf16.mxu0 %vm1171_vm1, %v1138_v60  ;;  %v443_v6 = vrot.slane %v441_v51, 1  ;;  %v455_v7 = vshll.u32 %v1473_v50, 16  ;;  %v1459_v10 = vcombine.low %v1937_v58, %v238_v59  ;;  %v450_v14 = vrot.slane %v448_v62, 1  ;;  %v240_v16 = vld [vmem:[%s1830_s24 + $0x34] sm:$0x1] }
  0x2b   : > { %629 = vrot.lane.b32.xlu0 %v1717_v4, %s1773_s25  ;;  %v1944_v4 = vsel %vm1171_vm1, %v1138_v60, 0  ;;  %v1460_v15 = vcombine.low %v1933_v55, %v239_v57  ;;  %v1960_v19 = vld [vmem:[%s1830_s24 + $0x38] sm:$0xf]  ;;  %v241_v20 = vld [vmem:[%s1830_s24 + $0x3c] sm:$0x1]  ;;  %v460_v21 = vshrl.u32 %v1474_v47, 16 }
  0x2c   : > { %v444_v24 = vor.u32 %v443_v6, %v439_v1  ;;  %v457_v25 = vrot.slane %v455_v7, 1  ;;  %v333_v26 = vshll.u32 %v1459_v10, 16  ;;  %v451_v29 = vor.u32 %v450_v14, %v446_v63  ;;  %v1451_v49 = vld [vmem:[%s1830_s24 + $0x2c] sm:$0x1]  ;;  %v1443_v51 = vld [vmem:[%s1830_s24 + $0x28] sm:$0xf] }
  0x2d   : > { %631 = vrot.lane.b32.xlu1 %v1716_v11, %s1773_s25  ;;  %v1949_v11 = vld [vmem:[%s1830_s24 + $0x30] sm:$0xf]  ;;  %v464_v30 = vrot.slane %v462_v3, 1  ;;  %v340_v31 = vshll.u32 %v1460_v15, 16  ;;  %v331_v34 = vshrl.u32 %v1459_v10, 16  ;;  %v338_v38 = vshrl.u32 %v1460_v15, 16 }
  0x2e   : > { %v335_v35 = vrot.slane %v333_v26, 1  ;;  %v1475_v57 = vcombine.low %v1443_v51, %v1451_v49  ;;  %v1454_v62 = vld [vmem:[%s1830_s24 + $0x44] sm:$0x1]  ;;  %v1445_v63 = vld [vmem:[%s1830_s24 + $0x38] sm:$0xf]  ;;  %v1467_v1 = vcombine.low %v1443_v51, %v1443_v51 }
  0x2f   : > { %990 = vrot.lane.b32.xlu0 %v970_v17, %s1773_s25  ;;  %v1957_v17 = vld [vmem:[%s2116_s1] sm:$0xff]   ;;  %v465_v37 = vor.u32 %v464_v30, %v460_v21  ;;  %v1469_v14 = vcombine.low %v1445_v63, %v1445_v63 }
  0x30   : > { %1619 = vmatprep.subr.bf16.mxu1 %v1957_v17  ;;  %v336_v42 = vor.u32 %v335_v35, %v331_v34  ;;  %v1446_v3 = vld [vmem:[%s1830_s24 + $0x40] sm:$0xf]  ;;  %v469_v7 = vshll.u32 %v1475_v57, 16  ;;  %v467_v15 = vshrl.u32 %v1475_v57, 16  ;;  %v1483_v57 = vld [vmem:[%s1830_s24 + $0x68] sm:$0xf] }
  0x31   : > { %992 = vrot.lane.b32.xlu1 %v977_v23, %s1773_s25  ;;  %v453_v23 = vshrl.u32 %v1473_v50, 16  ;;  %v1452_v50 = vld [vmem:[%s1830_s24 + $0x34] sm:$0x1]  ;;  %v1478_v10 = vcombine.low %v1446_v3, %v1454_v62  ;;  %v1470_v21 = vcombine.low %v1446_v3, %v1446_v3 }
  0x33   : > { %358 = vrot.lane.b32.xlu0 %v308_v27, %s1773_s25  ;;  %v1461_v27 = vcombine.low %v1949_v11, %v240_v16  ;;  %v458_v33 = vor.u32 %v457_v25, %v453_v23  ;;  %v471_v16 = vrot.slane %v469_v7, 1  ;;  %v490_v25 = vshll.u32 %v1478_v10, 16 }
  0x35   : > { %360 = vrot.lane.b32.xlu1 %v315_v32, %s1773_s25  ;;  %v1462_v32 = vcombine.low %v1960_v19, %v241_v20  ;;  %v347_v36 = vshll.u32 %v1461_v27, 16  ;;  %v472_v26 = vor.u32 %v471_v16, %v467_v15  ;;  %v1485_v16 = vld [vmem:[%s1830_s24 + $0x78] sm:$0xf] }
  0x37   : > { %362 = vrot.lane.b32.xlu0 %v322_v39, %s1773_s25  ;;  %v342_v39 = vrot.slane %v340_v31, 1  ;;  %v354_v40 = vshll.u32 %v1462_v32, 16  ;;  %v349_v45 = vrot.slane %v347_v36, 1  ;;  %v352_v47 = vshrl.u32 %v1462_v32, 16 }
  0x38   : > { %v488_v31 = vshrl.u32 %v1478_v10, 16  ;;  %v492_v32 = vrot.slane %v490_v25, 1 }
  0x39   : > { %364 = vrot.lane.b32.xlu1 %v329_v43, %s1773_s25  ;;  %v345_v43 = vshrl.u32 %v1461_v27, 16  ;;  %v343_v46 = vor.u32 %v342_v39, %v338_v38  ;;  %v356_v48 = vrot.slane %v354_v40, 1  ;;  %v1480_v38 = vld [vmem:[%s1830_s24 + $0x50] sm:$0xf] }
  0x3a   : > { %v493_v34 = vor.u32 %v492_v32, %v488_v31 }
  0x3b   : > { %398 = vrot.lane.b32.xlu0 %v1463_v53, %s1774_s30  ;;  %v350_v52 = vor.u32 %v349_v45, %v345_v43  ;;  %v1444_v53 = vld [vmem:[%s1830_s24 + $0x30] sm:$0xf]  ;;  %v357_v59 = vor.u32 %v356_v48, %v352_v47  ;;  %v1482_v45 = vld [vmem:[%s1830_s24 + $0x60] sm:$0xf] }
  0x3c   : > { %v1476_v60 = vcombine.low %v1444_v53, %v1452_v50 }
  0x3d   : > { %400 = vrot.lane.b32.xlu1 %v1464_v61, %s1774_s30  ;;  %v1453_v61 = vld [vmem:[%s1830_s24 + $0x3c] sm:$0x1] }
  0x3e   : > { %v1477_v6 = vcombine.low %v1445_v63, %v1453_v61  ;;  %v474_v23 = vshrl.u32 %v1476_v60, 16 }
  0x3f   : > { %402 = vrot.lane.b32.xlu0 %v1465_v8, %s1774_s30  ;;  %v1468_v8 = vcombine.low %v1444_v53, %v1444_v53 }
  0x40   : > { %v483_v20 = vshll.u32 %v1477_v6, 16  ;;  %v481_v27 = vshrl.u32 %v1477_v6, 16 }
  0x41   : > { %404 = vrot.lane.b32.xlu1 %v1466_v12, %s1774_s30  ;;  %v476_v12 = vshll.u32 %v1476_v60, 16 }
  0x43   : > { %494 = vrot.lane.b32.xlu0 %v444_v24, %s1775_s7  ;;  %v478_v24 = vrot.slane %v476_v12, 1 }
  0x45   : > { %496 = vrot.lane.b32.xlu1 %v451_v29, %s1775_s7  ;;  %v485_v29 = vrot.slane %v483_v20, 1  ;;  %v479_v30 = vor.u32 %v478_v24, %v474_v23 }
  0x47   : > { %498 = vrot.lane.b32.xlu0 %v458_v33, %s1775_s7  ;;  %v486_v33 = vor.u32 %v485_v29, %v481_v27  ;;  %v1744_v27 = vld [vmem:[%s1830_s24 + $0xd8] ss:$8 sps:$4 sm:$0xff]  }
  0x49   : > { %500 = vrot.lane.b32.xlu1 %v465_v37, %s1775_s7  ;;  %v1479_v37 = vld [vmem:[%s1830_s24 + $0x48] sm:$0xf] }
  0x4b   : > { %366 = vrot.lane.b32.xlu0 %v336_v42, %s1773_s25 }
  0x4d   : > { %368 = vrot.lane.b32.xlu1 %v343_v46, %s1773_s25  ;;  %v1481_v46 = vld [vmem:[%s1830_s24 + $0x58] sm:$0xf] }
  0x4f   : > { %370 = vrot.lane.b32.xlu0 %v350_v52, %s1773_s25  ;;  %v1484_v52 = vld [vmem:[%s1830_s24 + $0x70] sm:$0xf] }
  0x51   : > { %372 = vrot.lane.b32.xlu1 %v357_v59, %s1773_s25 }
  0x53   : > { %406 = vrot.lane.b32.xlu0 %v1467_v1, %s1774_s30 }
  0x55   : > { %408 = vrot.lane.b32.xlu1 %v1468_v8, %s1774_s30 }
  0x57   : > { %410 = vrot.lane.b32.xlu0 %v1469_v14, %s1774_s30 }
  0x59   : > { %412 = vrot.lane.b32.xlu1 %v1470_v21, %s1774_s30 }
  0x5b   : > { %502 = vrot.lane.b32.xlu0 %v472_v26, %s1775_s7 }
  0x5d   : > { %504 = vrot.lane.b32.xlu1 %v479_v30, %s1775_s7 }
  0x5f   : > { %506 = vrot.lane.b32.xlu0 %v486_v33, %s1775_s7 }
  0x61   : > { %508 = vrot.lane.b32.xlu1 %v493_v34, %s1775_s7  ;;  %v1745_v34 = vld [vmem:[%s1830_s24 + $0xe8] ss:$8 sps:$4 sm:$0xff]  }
  0x85   : > { %v624_v35 = vpop.permute.xlu1 %623  ;;  %v618_v36 = vpop.permute.xlu0 %617 }
  0x86   : > { %v635_v42 = vsel %vm510_vm2, %v1479_v37, %v618_v36  ;;  %v644_v49 = vsel %vm510_vm2, %v1482_v45, %v624_v35  ;;  %v1746_v35 = vld [vmem:[%s1830_s24 + $0xf8] ss:$8 sps:$4 sm:$0xff]  }
  0x89   : > { %v628_v39 = vpop.permute.xlu1 %627  ;;  %v620_v40 = vpop.permute.xlu0 %619 }
  0x8a   : > { %v638_v43 = vsel %vm510_vm2, %v1480_v38, %v620_v40  ;;  %v650_v60 = vsel %vm510_vm2, %v1484_v52, %v628_v39  ;;  %v1747_v38 = vld [vmem:[%s1830_s24 + $0x108] ss:$8 sps:$4 sm:$0xff]  }
  0x8b   : > { %v1503_v47 = vcombine.low %v635_v42, %v638_v43 }
  0x8d   : > { %v622_v48 = vpop.permute.xlu0 %621  ;;  %1611 = vmatprep.mubr.msk.bf16.mxu1 %vm535_vm3, %v1503_v47 }
  0x8e   : > { %v641_v51 = vsel %vm510_vm2, %v1481_v46, %v622_v48 }
  0x8f   : > { %v979_v50 = vpop.permute.xlu1 %978  ;;  %v1504_v53 = vcombine.low %v641_v51, %v644_v49 }
  0x90   : > { %v996_v63 = vsel %vm510_vm2, %v1837_v5, %v979_v50 }
  0x91   : > { %v626_v59 = vpop.permute.xlu0 %625  ;;  %1612 = vmatmul.mubr.msk.bf16.vlgmr.msra.gmra.mrb[0].mxu1 %vm535_vm3, %v1504_v53 }
  0x92   : > { %v647_v62 = vsel %vm510_vm2, %v1483_v57, %v626_v59  ;;  %1620 = vmatpush3.bf16.msra.mxu1 %v1957_v17 }
  0x93   : > { %v981_v61 = vpop.permute.xlu1 %980  ;;  %v1505_v3 = vcombine.low %v647_v62, %v650_v60 }
  0x94   : > { %v999_v1 = vsel %vm510_vm2, %v1844_v9, %v981_v61 }
  0x95   : > { %v1544_v6 = vcombine.low %v996_v63, %v999_v1  ;;  %v983_v7 = vpop.permute.xlu0 %982  ;;  %1615 = vmatprep.mubr.msk.bf16.mxu1 %vm535_vm3, %v1505_v3 }
  0x96   : > { %v1002_v10 = vsel %vm510_vm2, %v1856_v18, %v983_v7  ;;  %v1486_v18 = vld [vmem:[%s1830_s24 + $0x80] sm:$0xf] }
  0x97   : > { %1631 = vmatprep.mubr.msk.bf16.mxu0 %vm535_vm3, %v1544_v6  ;;  %v985_v8 = vpop.permute.xlu1 %984 }
  0x98   : > { %v1005_v17 = vsel %vm510_vm2, %v1850_v13, %v985_v8 }
  0x99   : > { %v1545_v5 = vcombine.low %v1002_v10, %v1005_v17  ;;  %v987_v12 = vpop.permute.xlu0 %986 }
  0x9a   : > { %v1008_v9 = vsel %vm510_vm2, %v1867_v28, %v987_v12 }
  0x9b   : > { %v989_v14 = vpop.permute.xlu1 %988  ;;  %1632 = vmatmul.mubr.msk.bf16.vlgmr.msra.gmra.mrb[0].mxu0 %vm535_vm3, %v1545_v5 }
  0x9c   : > { %v1011_v15 = vsel %vm510_vm2, %v1862_v22, %v989_v14  ;;  %1640 = vmatpush3.bf16.msra.mxu0 %v1944_v4 }
  0x9d   : > { %v1546_v20 = vcombine.low %v1008_v9, %v1011_v15  ;;  %v630_v21 = vpop.permute.xlu0 %629 }
  0x9e   : > { %v653_v13 = vsel %vm510_vm2, %v1485_v16, %v630_v21 }
  0x9f   : > { %v632_v23 = vpop.permute.xlu1 %631  ;;  %1635 = vmatprep.mubr.msk.bf16.mxu0 %vm535_vm3, %v1546_v20 }
  0xa0   : > { %v656_v24 = vsel %vm510_vm2, %v1486_v18, %v632_v23 }
  0xa1   : > { %v1506_v28 = vcombine.low %v653_v13, %v656_v24  ;;  %v991_v25 = vpop.permute.xlu0 %990 }
  0xa2   : > { %v1014_v22 = vsel %vm510_vm2, %v1879_v44, %v991_v25 }
  0xa3   : > { %v993_v26 = vpop.permute.xlu1 %992  ;;  %1616 = vmatmul.mubr.msk.bf16.gmra.mrb[4].mxu1 %vm535_vm3, %v1506_v28 }
  0xa4   : > { %v1017_v4 = vsel %vm510_vm2, %v1875_v41, %v993_v26 }
  0xa5   : > { %v1547_v29 = vcombine.low %v1014_v22, %v1017_v4  ;;  %v359_v30 = vpop.permute.xlu0 %358 }
  0xa6   : > { %v513_v39 = vsel %vm510_vm2, %v1887_v54, %v359_v30  ;;  %v1568_v30 = vld [vmem:[%s2117_s2] ss:$0 sm:$0xff] }
  0xa7   : > { %1636 = vmatmul.mubr.msk.bf16.gmra.mrb[4].mxu0 %vm535_vm3, %v1547_v29  ;;  %v361_v31 = vpop.permute.xlu1 %360 }
  0xa8   : > { %1641 = vmatprep.mubr.msk.bf16.mxu0 %vm510_vm2, %v1744_v27  ;;  %v516_v40 = vsel %vm510_vm2, %v1891_v56, %v361_v31 }
  0xa9   : > { %v363_v32 = vpop.permute.xlu0 %362 }
  0xaa   : > { %v519_v49 = vsel %vm510_vm2, %v1899_v0, %v363_v32 }
  0xab   : > { %v365_v33 = vpop.permute.xlu1 %364 }
  0xac   : > { %v522_v56 = vsel %vm510_vm2, %v1903_v2, %v365_v33  ;;  %v1569_v33 = vld [vmem:[%s2118_s3] ss:$0 sm:$0xff] }
  0xad   : > { %v399_v36 = vpop.permute.xlu0 %398 }
  0xae   : > { %v537_v42 = vsel %vm535_vm3, %v513_v39, %v399_v36 }
  0xaf   : > { %1642 = vmatmul.mubr.msk.bf16.vlgmr.msra.gmra.mrb[0].mxu0 %vm510_vm2, %v1745_v34  ;;  %v401_v44 = vpop.permute.xlu1 %400 }
  0xb0   : > { %1645 = vmatprep.mubr.msk.bf16.mxu0 %vm510_vm2, %v1746_v35  ;;  %v539_v45 = vsel %vm535_vm3, %v516_v40, %v401_v44 }
  0xb1   : > { %v403_v41 = vpop.permute.xlu0 %402 }
  0xb2   : > { %v541_v50 = vsel %vm535_vm3, %v519_v49, %v403_v41 }
  0xb3   : > { %v405_v37 = vpop.permute.xlu1 %404 }
  0xb4   : > { %v543_v52 = vsel %vm535_vm3, %v522_v56, %v405_v37 }
  0xb5   : > { %v495_v43 = vpop.permute.xlu0 %494 }
  0xb6   : > { %v554_v47 = vsel %vm552_vm4, %v537_v42, %v495_v43 }
  0xb7   : > { %1646 = vmatmul.mubr.msk.bf16.gmra.mrb[4].mxu0 %vm510_vm2, %v1747_v38  ;;  %v497_v46 = vpop.permute.xlu1 %496 }
  0xb8   : > { %v556_v48 = vsel %vm552_vm4, %v539_v45, %v497_v46 }
  0xb9   : > { %v1511_v54 = vcombine.low %v554_v47, %v556_v48  ;;  %v499_v51 = vpop.permute.xlu0 %498 }
  0xba   : > { %v558_v57 = vsel %vm552_vm4, %v541_v50, %v499_v51 }
  0xbb   : > { %v501_v53 = vpop.permute.xlu1 %500  ;;  %1621 = vmatprep.mubr.msk.bf16.mxu1 %vm785_vm5, %v1511_v54 }
  0xbc   : > { %v560_v59 = vsel %vm552_vm4, %v543_v52, %v501_v53 }
  0xbd   : > { %v1512_v60 = vcombine.low %v558_v57, %v560_v59  ;;  %v367_v61 = vpop.permute.xlu0 %366 }
  0xbe   : > { %v525_v2 = vsel %vm510_vm2, %v1937_v58, %v367_v61 }
  0xbf   : > { %v369_v62 = vpop.permute.xlu1 %368  ;;  %1622 = vmatmul.mubr.msk.bf16.vlgmr.msra.gmra.mrb[0].mxu1 %vm785_vm5, %v1512_v60 }
  0xc0   : > { %v528_v3 = vsel %vm510_vm2, %v1933_v55, %v369_v62 }
  0xc1   : > { %v371_v0 = vpop.permute.xlu0 %370 }
  0xc2   : > { %v531_v10 = vsel %vm510_vm2, %v1949_v11, %v371_v0 }
  0xc3   : > { %v373_v63 = vpop.permute.xlu1 %372 }
  0xc4   : > { %v534_v5 = vsel %vm510_vm2, %v1960_v19, %v373_v63 }
  0xc5   : > { %v407_v1 = vpop.permute.xlu0 %406 }
  0xc6   : > { %v545_v7 = vsel %vm535_vm3, %v525_v2, %v407_v1 }
  0xc7   : > { %v409_v6 = vpop.permute.xlu1 %408 }
  0xc8   : > { %v547_v8 = vsel %vm535_vm3, %v528_v3, %v409_v6 }
  0xc9   : > { %v411_v17 = vpop.permute.xlu0 %410 }
  0xca   : > { %v549_v14 = vsel %vm535_vm3, %v531_v10, %v411_v17 }
  0xcb   : > { %v413_v12 = vpop.permute.xlu1 %412 }
  0xcc   : > { %v551_v58 = vsel %vm535_vm3, %v534_v5, %v413_v12 }
  0xcd   : > { %v503_v9 = vpop.permute.xlu0 %502 }
  0xce   : > { %v562_v55 = vsel %vm552_vm4, %v545_v7, %v503_v9 }
  0xcf   : > { %v505_v15 = vpop.permute.xlu1 %504 }
  0xd0   : > { %v564_v16 = vsel %vm552_vm4, %v547_v8, %v505_v15 }
  0xd1   : > { %v1513_v20 = vcombine.low %v562_v55, %v564_v16  ;;  %v507_v18 = vpop.permute.xlu0 %506 }
  0xd2   : > { %v566_v11 = vsel %vm552_vm4, %v549_v14, %v507_v18 }
  0xd3   : > { %v509_v21 = vpop.permute.xlu1 %508  ;;  %1625 = vmatprep.mubr.msk.bf16.mxu1 %vm785_vm5, %v1513_v20 }
  0xd4   : > { %v568_v19 = vsel %vm552_vm4, %v551_v58, %v509_v21 }
  0xd5   : > { %v1514_v23 = vcombine.low %v566_v11, %v568_v19 }
  0xd7   : > { %1626 = vmatmul.mubr.msk.bf16.gmra.mrb[4].mxu1 %vm785_vm5, %v1514_v23 }
 0x182   : > { %v1643_v13 = vpop.f32.mrb[0].mxu0 }
 0x183   : > { %v1209_v24 = vpop.f32.mrb[1].mxu0 }
 0x184   : > { %v1644_v28 = vpop.f32.mrb[2].mxu0 }
 0x185   : > { %v1212_v25 = vpop.f32.mrb[3].mxu0 }
 0x18a   : > { %v1647_v26 = vpop.f32.mrb[4].mxu0 }
 0x18b   : > { %v1225_v22 = vpop.f32.mrb[5].mxu0 }
 0x18c   : > { %v1648_v4 = vpop.f32.mrb[6].mxu0 }
 0x18d   : > { %v1228_v27 = vpop.f32.mrb[7].mxu0 }
 0x192   : > { %v1623_v29 = vpop.f32.mrb[0].mxu1 }
 0x193   : > { %v1649_v31 = vadd.f32 %v1643_v13, %v1623_v29  ;;  %v832_v32 = vpop.f32.mrb[1].mxu1 }
 0x194   : > { %v1650_v34 = vadd.f32 %v1209_v24, %v832_v32  ;;  %v1624_v35 = vpop.f32.mrb[2].mxu1 }
 0x195   : > { %v1257_v36 = vmul.f32 %v1649_v31, %v1568_v30  ;;  %v1651_v44 = vadd.f32 %v1644_v28, %v1624_v35  ;;  %v835_v41 = vpop.f32.mrb[3].mxu1 }
 0x196   : > { %v1255_v37 = vmul.f32 %v1650_v34, %v1568_v30  ;;  %v1652_v38 = vadd.f32 %v1212_v25, %v835_v41 }
 0x197   : > { %v1272_v39 = vadd.f32 %v1569_v33, %v1257_v36  ;;  %v1258_v40 = vmul.f32 %v1651_v44, %v1568_v30 }
 0x198   : > { %v1270_v42 = vadd.f32 %v1569_v33, %v1255_v37  ;;  %v1256_v43 = vmul.f32 %v1652_v38, %v1568_v30 }
 0x199   : > { %v1280_v45 = vmax.f32 %v1272_v39, 0.0  ;;  %v1273_v46 = vadd.f32 %v1569_v33, %v1258_v40 }
 0x19a   : > { %v1278_v47 = vmax.f32 %v1270_v42, 0.0  ;;  %v1271_v48 = vadd.f32 %v1569_v33, %v1256_v43 }
 0x19b   : > { %v1583_v49 = vpack.c.bf16 %v1280_v45, %v1280_v45  ;;  %v1281_v54 = vmax.f32 %v1273_v46, 0.0 }
 0x19c   : > { %v1581_v56 = vpack.c.bf16 %v1278_v47, %v1278_v47  ;;  %v1279_v50 = vmax.f32 %v1271_v48, 0.0 }
 0x19d   : > { %1321 = vst.msk [vmem:[%s2088_s19 + $0x8] sm:$0xf] %vm1318_vm6, %v1583_v49  ;;  %v1584_v51 = vpack.c.bf16 %v1281_v54, %v1281_v54 }
 0x19e   : > { %1319 = vst.msk [vmem:[%s2088_s19] sm:$0xf] %vm1318_vm6, %v1581_v56  ;;  %v1582_v52 = vpack.c.bf16 %v1279_v50, %v1279_v50 }
 0x19f   : > { %1322 = vst.msk [vmem:[%s2088_s19 + $0xc] sm:$0xf] %vm1318_vm6, %v1584_v51 }
 0x1a0   : > { %1320 = vst.msk [vmem:[%s2088_s19 + $0x4] sm:$0xf] %vm1318_vm6, %v1582_v52 }
 0x1aa   : > { %v1627_v53 = vpop.f32.mrb[4].mxu1 }
 0x1ab   : > { %v1653_v57 = vadd.f32 %v1647_v26, %v1627_v53  ;;  %v848_v59 = vpop.f32.mrb[5].mxu1 }
 0x1ac   : > { %v1654_v60 = vadd.f32 %v1225_v22, %v848_v59  ;;  %v1628_v61 = vpop.f32.mrb[6].mxu1 }
 0x1ad   : > { %v1261_v62 = vmul.f32 %v1653_v57, %v1568_v30  ;;  %v1655_v0 = vadd.f32 %v1648_v4, %v1628_v61  ;;  %v851_v63 = vpop.f32.mrb[7].mxu1 }
 0x1ae   : > { %v1259_v2 = vmul.f32 %v1654_v60, %v1568_v30  ;;  %v1656_v1 = vadd.f32 %v1228_v27, %v851_v63 }
 0x1af   : > { %v1276_v3 = vadd.f32 %v1569_v33, %v1261_v62  ;;  %v1262_v6 = vmul.f32 %v1655_v0, %v1568_v30 }
 0x1b0   : > { %v1274_v7 = vadd.f32 %v1569_v33, %v1259_v2  ;;  %v1260_v8 = vmul.f32 %v1656_v1, %v1568_v30 }
 0x1b1   : > { %v1284_v10 = vmax.f32 %v1276_v3, 0.0  ;;  %v1277_v17 = vadd.f32 %v1569_v33, %v1262_v6 }
 0x1b2   : > { %v1282_v5 = vmax.f32 %v1274_v7, 0.0  ;;  %v1275_v12 = vadd.f32 %v1569_v33, %v1260_v8 }
 0x1b3   : > { %v1587_v14 = vpack.c.bf16 %v1284_v10, %v1284_v10  ;;  %v1285_v58 = vmax.f32 %v1277_v17, 0.0 }
 0x1b4   : > { %v1585_v9 = vpack.c.bf16 %v1282_v5, %v1282_v5  ;;  %v1283_v15 = vmax.f32 %v1275_v12, 0.0 }
 0x1b5   : > { %1325 = vst.msk [vmem:[%s2088_s19 + $0x18] sm:$0xf] %vm1318_vm6, %v1587_v14  ;;  %v1588_v55 = vpack.c.bf16 %v1285_v58, %v1285_v58 }
 0x1b6   : > { %1323 = vst.msk [vmem:[%s2088_s19 + $0x10] sm:$0xf] %vm1318_vm6, %v1585_v9  ;;  %v1586_v16 = vpack.c.bf16 %v1283_v15, %v1283_v15 }
 0x1b7   : > { %1326 = vst.msk [vmem:[%s2088_s19 + $0x1c] sm:$0xf] %vm1318_vm6, %v1588_v55 }
 0x1b8   : > { %1324 = vst.msk [vmem:[%s2088_s19 + $0x14] sm:$0xf] %vm1318_vm6, %v1586_v16 }
 0x1b9 PF: > { %s14_s17 = sadd.s32 1, %s1771_s17   ;;  %s2120_s15 = smov %s1767_s16 }
 0x1ba   : > { %p11_p5 = scmp.ge.s32.totalorder %s14_s17, 4   ;;  %s2121_s16 = smov %s2123_s18 }
 0x1bc   :  { %13 = sbr.rel (!%p11_p5) target bundleno = 2 (0x2), region = 72 }

// kernel: bottleneck_forward.5
= control target key start
LH: loop header
LB: loop body
LE: loop exit
PB: predicated region body
PF: predicated region fallthrough
CT: control target
= control target key end

     0   :  { %s1108_s27 = smov 0   ;;  %s1110_s28 = smov 0   ;;  %s1216_s0 = inlined_call_operand.vmem [shape: bf16[128,4], index: 0, kind: input, shape index: {}]   ;;  %s1217_s1 = inlined_call_operand.vmem [shape: bf16[4,16], index: 1, kind: input, shape index: {}]   ;;  %s1218_s2 = inlined_call_operand.vmem [shape: f32[1,16], index: 2, kind: input, shape index: {}]   ;;  %s1219_s3 = inlined_call_operand.vmem [shape: f32[1,16], index: 3, kind: input, shape index: {}]   ;;  %s1220_s4 = inlined_call_operand.vmem [shape: f32[128,4], index: 4, kind: input, shape index: {}]   ;;  %s1221_s5 = inlined_call_operand.vmem [shape: bf16[4,16], index: 5, kind: input, shape index: {}]   ;;  %s1222_s6 = inlined_call_operand.vmem [shape: f32[1,16], index: 6, kind: input, shape index: {}]   ;;  %s1223_s7 = inlined_call_operand.vmem [shape: f32[1,16], index: 7, kind: input, shape index: {}]   ;;  %s1224_s8 = inlined_call_operand.vmem [shape: bf16[128,16], index: 8, kind: output, shape index: {}]  }
   0x1   :  { %s1112_s29 = smov 0  }
   0x2 LB: > { %s30_s30 = sadd.s32 1, %s1057_s28  ;;  %p938_p0 = scmp.ge.s32.totalorder %s1061_s29, 1  ;;  %s1061_s29 = sphi %s1112_s29, %s18_s29   ;;  %s1057_s28 = sphi %s1110_s28, %s1226_s28   ;;  %s1053_s27 = sphi %s1108_s27, %s1225_s27  }
   0x3   : > { %p32_p1 = scmp.ge.s32.totalorder %s30_s30, 2  ;;  %p338_p2 = scmp.lt.s32.totalorder %s1061_s29, 3 }
   0x5   : > { %s1228_s30 = smov (%p32_p1, %s30_s30), 0  ;;  %p339_p3 = pnand %p938_p0, %p338_p2 }
   0x6   : > { %v450_v0 = vld [vmem:[%s1217_s1] sm:$0x3] (!%p339_p3)  ;;  %vm484_vm0 = vcmask (!%p339_p3), 1041408   ;;  %s939_s13 = sshll.u32 (!%p339_p3), %s1053_s27, 3  ;;  %vm471_vm1 = vcmask (!%p339_p3), 31744   ;;  %vm754_vm2 = vcmask (!%p339_p3), 125952  }
   0x7   : > { %342 = sbr.rel (%p339_p3) target bundleno = 256 (0x100), region = 52  ;;  %v595_v1 = vld [vmem:[%s1221_s5] sm:$0x3] (!%p339_p3)  ;;  %1009 = vmatprep.subr.msk.bf16.mxu0 (!%p339_p3), %vm484_vm0, %v450_v0  ;;  %v486_v2 = vsel (!%p339_p3), %vm484_vm0, %v450_v0, 0  ;;  %p401_p4 = scmp.lt.s32.totalorder (!%p339_p3), %s939_s13, 15 }
   0x8   : > { %1010 = vmatprep.subr.msk.bf16.mxu1 (!%p339_p3), %vm484_vm0, %v595_v1  ;;  %v609_v3 = vsel (!%p339_p3), %vm484_vm0, %v595_v1, 0  ;;  %990 = vmatpush3.bf16.msra.mxu0 (!%p339_p3), %v486_v2  ;;  %v953_v20 = vld [vmem:[%s1218_s2] ss:$0 sm:$0xff] (!%p339_p3) }
   0x9   : > { %1000 = vmatpush3.bf16.msra.mxu1 (!%p339_p3), %v609_v3  ;;  %v1158_v22 = vld [vmem:[%s1219_s3] ss:$0 sm:$0xff] (!%p339_p3) }
   0xa   : > { %v959_v23 = vld [vmem:[%s1222_s6] ss:$0 sm:$0xff] (!%p339_p3) }
   0xb   : > { %v1167_v34 = vld [vmem:[%s1223_s7] ss:$0 sm:$0xff] (!%p339_p3) }
   0xe   : > { %s1230_s13 = smov (!%p401_p4, %s939_s13), 15 }
   0xf   : > { %s940_s14 = sshll.u32 %s1230_s13, 2  ;;  %s942_s15 = sshll.u32 %s1230_s13, 3 }
  0x10   : > { %s404_s18 = scalar_lea.vmem %s1216_s0, %s940_s14  ;;  %s420_s21 = scalar_lea.vmem %s1220_s4, %s942_s15 }
  0x11   : > { %v1035_v4 = vld [vmem:[%s404_s18] sm:$0xff]   ;;  %v584_v6 = vld [vmem:[%s420_s21 + $0x8] sm:$0xff]  ;;  %v585_v9 = vld [vmem:[%s420_s21 + $0x10] sm:$0xff]  ;;  %s1180_s15 = scalar_lea.vmem %s1224_s8, %s940_s14 }
  0x12   : > { %v583_v5 = vld [vmem:[%s420_s21] sm:$0xff]  ;;  %991 = vmatprep.mubr.msk.bf16.mxu0 %vm471_vm1, %v1035_v4  ;;  %v1036_v8 = vld [vmem:[%s404_s18 + $0x8] sm:$0xff]   ;;  %v586_v10 = vld [vmem:[%s420_s21 + $0x18] sm:$0xff] }
  0x13   : > { %v591_v7 = vpack.c.bf16 %v584_v6, %v583_v5  ;;  %992 = vmatmul.mubr.msk.bf16.vlgmr.msra.gmra.mrb[0].mxu0 %vm471_vm1, %v1036_v8  ;;  %v592_v11 = vpack.c.bf16 %v586_v10, %v585_v9  ;;  %v1037_v12 = vld [vmem:[%s404_s18 + $0x10] sm:$0xff]   ;;  %v587_v13 = vld [vmem:[%s420_s21 + $0x20] sm:$0xff]  ;;  %v588_v14 = vld [vmem:[%s420_s21 + $0x28] sm:$0xff] }
  0x14   : > { %v593_v15 = vpack.c.bf16 %v588_v14, %v587_v13  ;;  %995 = vmatprep.mubr.msk.bf16.mxu0 %vm471_vm1, %v1037_v12  ;;  %v589_v16 = vld [vmem:[%s420_s21 + $0x30] sm:$0xff]  ;;  %v590_v17 = vld [vmem:[%s420_s21 + $0x38] sm:$0xff] }
  0x15   : > { %1001 = vmatprep.mubr.msk.bf16.mxu1 %vm471_vm1, %v591_v7  ;;  %v1038_v18 = vld [vmem:[%s404_s18 + $0x18] sm:$0xff]   ;;  %v594_v19 = vpack.c.bf16 %v590_v17, %v589_v16 }
  0x16   : > { %1002 = vmatmul.mubr.msk.bf16.vlgmr.msra.gmra.mrb[0].mxu1 %vm471_vm1, %v592_v11 }
  0x17   : > { %1005 = vmatprep.mubr.msk.bf16.mxu1 %vm471_vm1, %v593_v15 }
  0x1b   : > { %996 = vmatmul.mubr.msk.bf16.gmra.mrb[4].mxu0 %vm471_vm1, %v1038_v18 }
  0x1e   : > { %1006 = vmatmul.mubr.msk.bf16.gmra.mrb[4].mxu1 %vm471_vm1, %v594_v19 }
  0xe6   : > { %v993_v21 = vpop.f32.mrb[0].mxu0 }
  0xe7   : > { %v562_v24 = vmul.f32 %v993_v21, %v953_v20  ;;  %v522_v25 = vpop.f32.mrb[1].mxu0 }
  0xe8   : > { %v560_v27 = vmul.f32 %v953_v20, %v522_v25  ;;  %v994_v28 = vpop.f32.mrb[2].mxu0 }
  0xe9   : > { %v1003_v26 = vpop.f32.mrb[0].mxu1  ;;  %v577_v29 = vadd.f32 %v1158_v22, %v562_v24  ;;  %v563_v32 = vmul.f32 %v994_v28, %v953_v20  ;;  %v525_v33 = vpop.f32.mrb[3].mxu0 }
  0xea   : > { %v685_v30 = vmul.f32 %v1003_v26, %v959_v23  ;;  %v645_v31 = vpop.f32.mrb[1].mxu1  ;;  %v575_v35 = vadd.f32 %v1158_v22, %v560_v27  ;;  %v561_v38 = vmul.f32 %v953_v20, %v525_v33 }
  0xeb   : > { %v683_v36 = vmul.f32 %v959_v23, %v645_v31  ;;  %v1004_v37 = vpop.f32.mrb[2].mxu1  ;;  %v578_v40 = vadd.f32 %v1158_v22, %v563_v32 }
  0xec   : > { %v693_v39 = vadd.f32 %v685_v30, %v577_v29  ;;  %v686_v41 = vmul.f32 %v1004_v37, %v959_v23  ;;  %v648_v42 = vpop.f32.mrb[3].mxu1  ;;  %v576_v44 = vadd.f32 %v1158_v22, %v561_v38 }
  0xed   : > { %v691_v43 = vadd.f32 %v683_v36, %v575_v35  ;;  %v684_v45 = vmul.f32 %v959_v23, %v648_v42 }
  0xee   : > { %v708_v46 = vadd.f32 %v1167_v34, %v693_v39  ;;  %v694_v47 = vadd.f32 %v686_v41, %v578_v40  ;;  %v997_v50 = vpop.f32.mrb[4].mxu0 }
  0xef   : > { %v706_v48 = vadd.f32 %v1167_v34, %v691_v43  ;;  %v692_v49 = vadd.f32 %v684_v45, %v576_v44  ;;  %v566_v53 = vmul.f32 %v997_v50, %v953_v20  ;;  %v538_v54 = vpop.f32.mrb[5].mxu0 }
  0xf0   : > { %v716_v51 = vmax.f32 %v708_v46, 0.0  ;;  %v709_v52 = vadd.f32 %v1167_v34, %v694_v47  ;;  %v564_v58 = vmul.f32 %v953_v20, %v538_v54  ;;  %v998_v59 = vpop.f32.mrb[6].mxu0 }
  0xf1   : > { %v714_v55 = vmax.f32 %v706_v48, 0.0  ;;  %v707_v56 = vadd.f32 %v1167_v34, %v692_v49  ;;  %v1007_v57 = vpop.f32.mrb[4].mxu1  ;;  %v581_v62 = vadd.f32 %v1158_v22, %v566_v53  ;;  %v541_v1 = vpop.f32.mrb[7].mxu0  ;;  %v567_v9 = vmul.f32 %v998_v59, %v953_v20 }
  0xf2   : > { %v973_v60 = vpack.c.bf16 %v716_v51, %v716_v51  ;;  %v717_v61 = vmax.f32 %v709_v52, 0.0  ;;  %v689_v63 = vmul.f32 %v1007_v57, %v959_v23  ;;  %v661_v0 = vpop.f32.mrb[5].mxu1  ;;  %v579_v4 = vadd.f32 %v1158_v22, %v564_v58 }
  0xf3   : > { %v971_v2 = vpack.c.bf16 %v714_v55, %v714_v55  ;;  %v715_v3 = vmax.f32 %v707_v56, 0.0  ;;  %v687_v5 = vmul.f32 %v959_v23, %v661_v0  ;;  %v1008_v6 = vpop.f32.mrb[6].mxu1  ;;  %v565_v14 = vmul.f32 %v953_v20, %v541_v1 }
  0xf4   : > { %757 = vst.msk [vmem:[%s1180_s15 + $0x8] sm:$0xf] %vm754_vm2, %v973_v60  ;;  %v974_v7 = vpack.c.bf16 %v717_v61, %v717_v61  ;;  %v697_v8 = vadd.f32 %v689_v63, %v581_v62  ;;  %v690_v10 = vmul.f32 %v1008_v6, %v959_v23  ;;  %v664_v11 = vpop.f32.mrb[7].mxu1  ;;  %v582_v17 = vadd.f32 %v1158_v22, %v567_v9 }
  0xf5   : > { %755 = vst.msk [vmem:[%s1180_s15] sm:$0xf] %vm754_vm2, %v971_v2  ;;  %v972_v12 = vpack.c.bf16 %v715_v3, %v715_v3  ;;  %v695_v13 = vadd.f32 %v687_v5, %v579_v4  ;;  %v688_v15 = vmul.f32 %v959_v23, %v664_v11  ;;  %v580_v19 = vadd.f32 %v1158_v22, %v565_v14 }
  0xf6   : > { %758 = vst.msk [vmem:[%s1180_s15 + $0xc] sm:$0xf] %vm754_vm2, %v974_v7  ;;  %v712_v16 = vadd.f32 %v1167_v34, %v697_v8  ;;  %v698_v24 = vadd.f32 %v690_v10, %v582_v17 }
  0xf7   : > { %756 = vst.msk [vmem:[%s1180_s15 + $0x4] sm:$0xf] %vm754_vm2, %v972_v12  ;;  %v710_v18 = vadd.f32 %v1167_v34, %v695_v13  ;;  %v696_v25 = vadd.f32 %v688_v15, %v580_v19 }
  0xf8   : > { %v720_v21 = vmax.f32 %v712_v16, 0.0  ;;  %v713_v26 = vadd.f32 %v1167_v34, %v698_v24 }
  0xf9   : > { %v718_v20 = vmax.f32 %v710_v18, 0.0  ;;  %v711_v28 = vadd.f32 %v1167_v34, %v696_v25 }
  0xfa   : > { %v977_v23 = vpack.c.bf16 %v720_v21, %v720_v21  ;;  %v721_v29 = vmax.f32 %v713_v26, 0.0 }
  0xfb   : > { %v975_v27 = vpack.c.bf16 %v718_v20, %v718_v20  ;;  %v719_v30 = vmax.f32 %v711_v28, 0.0 }
  0xfc   : > { %761 = vst.msk [vmem:[%s1180_s15 + $0x18] sm:$0xf] %vm754_vm2, %v977_v23  ;;  %v978_v31 = vpack.c.bf16 %v721_v29, %v721_v29 }
  0xfd   : > { %759 = vst.msk [vmem:[%s1180_s15 + $0x10] sm:$0xf] %vm754_vm2, %v975_v27  ;;  %v976_v32 = vpack.c.bf16 %v719_v30, %v719_v30 }
  0xfe   : > { %762 = vst.msk [vmem:[%s1180_s15 + $0x1c] sm:$0xf] %vm754_vm2, %v978_v31 }
  0xff   : > { %760 = vst.msk [vmem:[%s1180_s15 + $0x14] sm:$0xf] %vm754_vm2, %v976_v32 }
 0x100 PF: > { %s18_s29 = sadd.s32 1, %s1061_s29   ;;  %s1225_s27 = smov %s1057_s28 }
 0x101   : > { %p15_p5 = scmp.ge.s32.totalorder %s18_s29, 4   ;;  %s1226_s28 = smov %s1228_s30 }
 0x103   :  { %17 = sbr.rel (!%p15_p5) target bundleno = 2 (0x2), region = 103 }

</bundles_post_ra>
